<compile_context>
chip_gen: v7x
topology: tpu7x:2x2x1
jax: 0.10.0
libtpu: 0.0.40
codegen_flags: <defaults>
</compile_context>

<pallas_src>
import functools
import math

import jax
import jax.numpy as jnp
from jax import lax
from jax.experimental import pallas as pl
from jax.experimental.pallas import tpu as pltpu


_VMEM_LIMIT = 32 * 1024 * 1024   # fits scoped-VMEM defaults on v5e/v6e/v7x


def _pick_tile(n, candidates=(512, 256, 128)):
    """Largest lane-dense tile that divides n, else the full extent."""
    for c in candidates:
        if n % c == 0:
            return c
    return n


# ---------------------------------------------------------------------------
# Kernel 1: fused InceptionModule for all (proj, head) modules, one batch per step
# ---------------------------------------------------------------------------

def _inception_qkv_kernel(x_ref, wb_ref, wc_ref, wm_ref, sc_ref, sh_ref, o_ref,
                          *, L, nf, ks, pad):
    x = x_ref[0]                                        # (d_in, Lp) f32, zero-padded along L
    xb = x.astype(jnp.bfloat16)

    # bottleneck 1x1 conv (no bias) -- applied to padded x (pad value 0 => commutes)
    bott = jnp.dot(wb_ref[0], xb, preferred_element_type=jnp.float32)     # (nf, Lp)
    bott = bott.astype(jnp.bfloat16)

    # three 'same' convs (stacked along C_out; smaller ks were zero-padded to `ks` taps):
    # tap accumulation entirely in VMEM -- no im2col materialization.
    acc = jnp.zeros((3 * nf, L), jnp.float32)
    for t in range(ks):                                  # static unroll
        acc = acc + jnp.dot(wc_ref[0, t], bott[:, t:t + L],
                            preferred_element_type=jnp.float32)

    # MaxPool1d(3, stride=1, padding=1) branch (implicit -inf padding) + 1x1 conv
    d_in = x.shape[0]
    xc = x[:, pad:pad + L]
    xl = x[:, pad - 1:pad - 1 + L]
    xr = x[:, pad + 1:pad + 1 + L]
    posn = lax.broadcasted_iota(jnp.int32, (d_in, L), 1)
    m = jnp.maximum(xc, jnp.maximum(jnp.where(posn > 0, xl, -jnp.inf),
                                    jnp.where(posn < L - 1, xr, -jnp.inf)))
    mx = jnp.dot(wm_ref[0], m.astype(jnp.bfloat16), preferred_element_type=jnp.float32)

    # fused inference BatchNorm + ReLU epilogue, stored into the module's 4*nf channels
    scale = sc_ref[0]                                    # (4nf, 1)
    shift = sh_ref[0]
    o_ref[0, 0:3 * nf, :] = jnp.maximum(acc * scale[0:3 * nf] + shift[0:3 * nf], 0.0)
    o_ref[0, 3 * nf:4 * nf, :] = jnp.maximum(mx * scale[3 * nf:] + shift[3 * nf:], 0.0)


def inception_qkv(x_pad, wb, wc, wm, bn_scale, bn_shift, *, H, B, L, nf, ks):
    """All 3*H InceptionModules in one call.  Output: (3*H*B, 4*nf, L), row = (proj*H+h)*B + b."""
    d_in = x_pad.shape[1]
    Lp = x_pad.shape[2]
    pad = (ks - 1) // 2
    kernel = functools.partial(_inception_qkv_kernel, L=L, nf=nf, ks=ks, pad=pad)
    return pl.pallas_call(
        kernel,
        out_shape=jax.ShapeDtypeStruct((3 * H * B, 4 * nf, L), jnp.float32),
        grid=(3, H, B),
        in_specs=[
            pl.BlockSpec((1, d_in, Lp), lambda p, h, b: (b, 0, 0)),
            pl.BlockSpec((1, nf, d_in), lambda p, h, b: (p * H + h, 0, 0)),
            pl.BlockSpec((1, ks, 3 * nf, nf), lambda p, h, b: (p * H + h, 0, 0, 0)),
            pl.BlockSpec((1, nf, d_in), lambda p, h, b: (p * H + h, 0, 0)),
            pl.BlockSpec((1, 4 * nf, 1), lambda p, h, b: (p * H + h, 0, 0)),
            pl.BlockSpec((1, 4 * nf, 1), lambda p, h, b: (p * H + h, 0, 0)),
        ],
        out_specs=pl.BlockSpec((1, 4 * nf, L),
                               lambda p, h, b: ((p * H + h) * B + b, 0, 0)),
        compiler_params=pltpu.CompilerParams(
            dimension_semantics=("parallel", "parallel", "parallel"),
            vmem_limit_bytes=_VMEM_LIMIT),
    )(x_pad, wb, wc, wm, bn_scale, bn_shift)


# ---------------------------------------------------------------------------
# Kernel 2: attention per batch-head (no attention-weights output)
# ---------------------------------------------------------------------------

def _attn_kernel(q_ref, k_ref, v_ref, o_ref, *, scale):
    q = (q_ref[0] * scale).astype(jnp.bfloat16)          # (L, dh) -- 1/sqrt(dh) folded into q
    k = k_ref[0].astype(jnp.bfloat16)                    # (L, dh)
    s = lax.dot_general(q, k, (((1,), (1,)), ((), ())),
                        preferred_element_type=jnp.float32)   # (Lq, Lk)
    s = s - jnp.max(s, axis=-1, keepdims=True)
    e = jnp.exp(s)
    p = e * pl.reciprocal(jnp.sum(e, axis=-1, keepdims=True), approx=True)
    v = v_ref[0].astype(jnp.bfloat16)                    # (dh, Lk) channel-major
    ctx = lax.dot_general(v, p.astype(jnp.bfloat16), (((1,), (1,)), ((), ())),
                          preferred_element_type=jnp.float32)  # (dh, Lq)
    o_ref[0] = ctx


def attention(q_rm, k_rm, qkv_flat, *, HB, dh, L):
    """q_rm, k_rm: (HB, L, dh); v taken channel-major straight from qkv_flat rows [2*HB:3*HB]."""
    kernel = functools.partial(_attn_kernel, scale=1.0 / math.sqrt(dh))
    return pl.pallas_call(
        kernel,
        out_shape=jax.ShapeDtypeStruct((HB, dh, L), jnp.float32),
        grid=(HB,),
        in_specs=[pl.BlockSpec((1, L, dh), lambda i: (i, 0, 0)),
                  pl.BlockSpec((1, L, dh), lambda i: (i, 0, 0)),
                  pl.BlockSpec((1, dh, L), lambda i: (2 * HB + i, 0, 0))],
        out_specs=pl.BlockSpec((1, dh, L), lambda i: (i, 0, 0)),
        compiler_params=pltpu.CompilerParams(
            dimension_semantics=("parallel",), vmem_limit_bytes=_VMEM_LIMIT),
    )(q_rm, k_rm, qkv_flat)


# ---------------------------------------------------------------------------
# Kernels 3/4: fused matmul + (bias/BN/residual/ReLU) epilogues, tiled over N = B*L
# ---------------------------------------------------------------------------

def _mm_affine_kernel(w_ref, x_ref, scale_ref, shift_ref, o_ref, *, relu):
    y = jnp.dot(w_ref[...], x_ref[...].astype(jnp.bfloat16),
                preferred_element_type=jnp.float32)
    y = y * scale_ref[...] + shift_ref[...]
    if relu:
        y = jnp.maximum(y, 0.0)
    o_ref[...] = y


def mm_affine(w_bf16, x, scale, shift, relu=False):
    """out = relu?( (W @ x) * scale + shift ), W in bf16, f32 accumulate/epilogue."""
    M, K = w_bf16.shape
    _, N = x.shape
    tn = _pick_tile(N)
    kernel = functools.partial(_mm_affine_kernel, relu=relu)
    return pl.pallas_call(
        kernel,
        out_shape=jax.ShapeDtypeStruct((M, N), jnp.float32),
        grid=(N // tn,),
        in_specs=[pl.BlockSpec((M, K), lambda i: (0, 0)),
                  pl.BlockSpec((K, tn), lambda i: (0, i)),
                  pl.BlockSpec((M, 1), lambda i: (0, 0)),
                  pl.BlockSpec((M, 1), lambda i: (0, 0))],
        out_specs=pl.BlockSpec((M, tn), lambda i: (0, i)),
        compiler_params=pltpu.CompilerParams(
            dimension_semantics=("parallel",), vmem_limit_bytes=_VMEM_LIMIT),
    )(w_bf16, x,
      scale.reshape(M, 1).astype(jnp.float32),
      shift.reshape(M, 1).astype(jnp.float32))


def _mm_res_affine_kernel(w_ref, x_ref, res_ref, scale_ref, shift_ref, rscale_ref, o_ref):
    y = jnp.dot(w_ref[...], x_ref[...].astype(jnp.bfloat16),
                preferred_element_type=jnp.float32)
    o_ref[...] = y * scale_ref[...] + res_ref[...] * rscale_ref[...] + shift_ref[...]


def mm_res_affine(w_bf16, x, res, scale, shift, rscale):
    """out = (W @ x) * scale + res * rscale + shift  (residual add + BN folded into epilogue)."""
    M, K = w_bf16.shape
    _, N = x.shape
    tn = _pick_tile(N)
    return pl.pallas_call(
        _mm_res_affine_kernel,
        out_shape=jax.ShapeDtypeStruct((M, N), jnp.float32),
        grid=(N // tn,),
        in_specs=[pl.BlockSpec((M, K), lambda i: (0, 0)),
                  pl.BlockSpec((K, tn), lambda i: (0, i)),
                  pl.BlockSpec((M, tn), lambda i: (0, i)),
                  pl.BlockSpec((M, 1), lambda i: (0, 0)),
                  pl.BlockSpec((M, 1), lambda i: (0, 0)),
                  pl.BlockSpec((M, 1), lambda i: (0, 0))],
        out_specs=pl.BlockSpec((M, tn), lambda i: (0, i)),
        compiler_params=pltpu.CompilerParams(
            dimension_semantics=("parallel",), vmem_limit_bytes=_VMEM_LIMIT),
    )(w_bf16, x, res,
      scale.reshape(M, 1).astype(jnp.float32),
      shift.reshape(M, 1).astype(jnp.float32),
      rscale.reshape(M, 1).astype(jnp.float32))


# ---------------------------------------------------------------------------
# Forward pass (6 pallas_calls total)
# ---------------------------------------------------------------------------

def encoder_layer_forward(src_bdl, kp):
    """InceptionSelfAttnEncoderLayer.forward.  src: (B, d_in, L) -> (B, d_model, L)."""
    B, d_in, L = src_bdl.shape
    H, nf, ks = kp['num_heads'], kp['nf'], kp['ks']
    pad = (ks - 1) // 2
    d_model = kp['w_fl'].shape[0]
    assert d_in != d_model, "only the ConvBlock shortcut path (d_in != d_model) is implemented"

    x = src_bdl.astype(jnp.float32)
    x_pad = jnp.pad(x, ((0, 0), (0, 0), (pad, pad)))                   # (B, d_in, L+2*pad)

    # --- q/k/v InceptionModule projections: one fused kernel over (proj, head, batch)
    qkv = inception_qkv(x_pad, kp['wb'], kp['wc'], kp['wm'],
                        kp['bn_scale'], kp['bn_shift'],
                        H=H, B=B, L=L, nf=nf, ks=ks)                   # (3*H*B, 4nf, L)
    dh = 4 * nf
    HB = H * B

    # --- multi-head scaled-dot-product attention (per batch-head, weights output dropped)
    q_rm = jnp.swapaxes(qkv[:HB], 1, 2)                                # (H*B, L, dh)
    k_rm = jnp.swapaxes(qkv[HB:2 * HB], 1, 2)
    ctx = attention(q_rm, k_rm, qkv, HB=HB, dh=dh, L=L)                # (H*B, dh, L)

    c_out = H * dh
    N = B * L
    ctx2d = ctx.reshape(H, B, dh, L).transpose(0, 2, 1, 3).reshape(c_out, N)
    x2d = jnp.transpose(x, (1, 0, 2)).reshape(d_in, N)

    # --- post-attention trunk: 4 fused matmul kernels (dropout = identity, eval mode)
    # shortcut = ConvBlock(d_in, d_model, ks=1, act=None): conv1x1 (no bias) + BN
    sc = mm_affine(kp['w_sc'], x2d, kp['sc_scale'], kp['sc_shift'])
    # src = norm(shortcut(src) + final_linear(ctx))   (bias & norm folded into epilogue)
    src = mm_res_affine(kp['w_fl'], ctx2d, sc, kp['fl_scale'], kp['fl_shift'], kp['fl_rscale'])
    # feed-forward: conv1x1 (no bias) + ReLU; then conv1x1, shortcut2 (BN) residual, norm2
    hid = mm_affine(kp['w_l1'], src, kp['ones_ff'], kp['zeros_ff'], relu=True)
    out = mm_res_affine(kp['w_l2'], hid, src, kp['l2_scale'], kp['l2_shift'], kp['l2_rscale'])

    return out.reshape(d_model, B, L).transpose(1, 0, 2)               # (B, d_model, L)


# ---------------------------------------------------------------------------
# Deterministic parameter init (shapes from the module's __init__) + packing
# ---------------------------------------------------------------------------

def init_params(key, d_in, d_model, num_heads, dim_feedforward):
    assert d_model % (num_heads * 4) == 0
    nf = d_model // num_heads // 4
    ks_list = [39, 19, 9]                     # from InceptionModule default ks=40
    keys = iter(jax.random.split(key, 512))

    def nrm(shape, s=0.1):
        return s * jax.random.normal(next(keys), shape, jnp.float32)

    def bn_params(c, eps=1e-5):
        gamma = 1.0 + nrm((c,), 0.05)
        beta = nrm((c,), 0.05)
        mean = nrm((c,), 0.05)
        var = 1.0 + 0.05 * jnp.abs(jax.random.normal(next(keys), (c,), jnp.float32))
        scale = gamma / jnp.sqrt(var + eps)
        shift = beta - mean * scale
        return scale, shift

    def inception_params():
        return dict(
            bottleneck=nrm((nf, d_in, 1)),
            convs=[nrm((nf, nf, k)) for k in ks_list],
            maxconv=nrm((nf, d_in, 1)),
            bn=bn_params(4 * nf),
        )

    return dict(
        self_attn=dict(
            wq=[inception_params() for _ in range(num_heads)],
            wk=[inception_params() for _ in range(num_heads)],
            wv=[inception_params() for _ in range(num_heads)],
            final_linear=(nrm((d_model, d_model)), nrm((d_model,))),
        ),
        shortcut_conv=nrm((d_model, d_in)),
        shortcut_bn=bn_params(d_model),
        norm=bn_params(d_model),
        linear1=nrm((dim_feedforward, d_model)),
        linear2=nrm((d_model, dim_feedforward)),
        shortcut2=bn_params(d_model),
        norm2=bn_params(d_model),
    )


def pack_params(p, num_heads):
    """Fold / stack the torch-style params into kernel-ready arrays (weights in bf16)."""
    KS = 39
    nf = p['self_attn']['wq'][0]['bottleneck'].shape[0]

    def pad_taps(w):                                   # (nf, nf, k) -> centered (nf, nf, KS)
        k = w.shape[-1]
        off = (KS - k) // 2
        return jnp.pad(w, ((0, 0), (0, 0), (off, KS - k - off)))

    wb, wc, wm, bsc, bsh = [], [], [], [], []
    for proj in ('wq', 'wk', 'wv'):
        for m in p['self_attn'][proj]:
            wb.append(m['bottleneck'][:, :, 0])                                   # (nf, d_in)
            stacked = jnp.concatenate([pad_taps(w) for w in m['convs']], axis=0)  # (3nf, nf, KS)
            wc.append(jnp.transpose(stacked, (2, 0, 1)))                          # (KS, 3nf, nf)
            wm.append(m['maxconv'][:, :, 0])
            s, sh = m['bn']
            bsc.append(s.reshape(-1, 1))
            bsh.append(sh.reshape(-1, 1))

    wfl, bfl = p['self_attn']['final_linear']
    sc_s, sc_b = p['shortcut_bn']
    n_s, n_b = p['norm']
    s2_s, s2_b = p['shortcut2']
    n2_s, n2_b = p['norm2']
    ff = p['linear1'].shape[0]

    return dict(
        num_heads=num_heads, nf=nf, ks=KS,
        wb=jnp.stack(wb).astype(jnp.bfloat16),
        wc=jnp.stack(wc).astype(jnp.bfloat16),
        wm=jnp.stack(wm).astype(jnp.bfloat16),
        bn_scale=jnp.stack(bsc).astype(jnp.float32),
        bn_shift=jnp.stack(bsh).astype(jnp.float32),
        w_sc=p['shortcut_conv'].astype(jnp.bfloat16),
        sc_scale=sc_s, sc_shift=sc_b,
        w_fl=wfl.astype(jnp.bfloat16),
        fl_scale=n_s, fl_rscale=n_s, fl_shift=bfl * n_s + n_b,
        w_l1=p['linear1'].astype(jnp.bfloat16),
        ones_ff=jnp.ones((ff,), jnp.float32), zeros_ff=jnp.zeros((ff,), jnp.float32),
        w_l2=p['linear2'].astype(jnp.bfloat16),
        l2_scale=n2_s, l2_rscale=s2_s * n2_s, l2_shift=s2_b * n2_s + n2_b,
    )


if __name__ == "__main__":
    B, d_in, L = 2, 4, 16
    d_model, num_heads, dim_feedforward = 32, 4, 32

    key = jax.random.PRNGKey(0)
    pkey, xkey = jax.random.split(key)
    params = init_params(pkey, d_in, d_model, num_heads, dim_feedforward)
    kp = pack_params(params, num_heads)
    src = jax.random.normal(xkey, (B, d_in, L), jnp.float32)   # torch NCL conv layout

    out = encoder_layer_forward(src, kp)
    out = jax.block_until_ready(out)
    assert out.shape == (B, d_model, L)
    assert bool(jnp.all(jnp.isfinite(out)))
    print("KERNEL_OK")
</pallas_src>

<mosaic_0001>
module attributes {stable_mosaic.version = 11 : i64} {
  func.func @_inception_qkv_kernel(%arg0: i32, %arg1: i32, %arg2: i32, %arg3: memref<1x4x54xf32, #tpu.memory_space<vmem>>, %arg4: memref<1x2x4xbf16, #tpu.memory_space<vmem>>, %arg5: memref<1x39x6x2xbf16, #tpu.memory_space<vmem>>, %arg6: memref<1x2x4xbf16, #tpu.memory_space<vmem>>, %arg7: memref<1x8x1xf32, #tpu.memory_space<vmem>>, %arg8: memref<1x8x1xf32, #tpu.memory_space<vmem>>, %arg9: memref<1x8x16xf32, #tpu.memory_space<vmem>>) attributes {dimension_semantics = [#tpu.dimension_semantics<parallel>, #tpu.dimension_semantics<parallel>, #tpu.dimension_semantics<parallel>], iteration_bounds = array<i64: 3, 4, 2>, scalar_prefetch = 0 : i64, scratch_operands = 0 : i64, tpu.core_type = #tpu.core_type<tc>, window_params = [{transform_indices = @transform_0, window_bounds = array<i64: 1, 4, 54>}, {transform_indices = @transform_1, window_bounds = array<i64: 1, 2, 4>}, {transform_indices = @transform_2, window_bounds = array<i64: 1, 39, 6, 2>}, {transform_indices = @transform_3, window_bounds = array<i64: 1, 2, 4>}, {transform_indices = @transform_4, window_bounds = array<i64: 1, 8, 1>}, {transform_indices = @transform_5, window_bounds = array<i64: 1, 8, 1>}, {transform_indices = @transform_6, window_bounds = array<i64: 1, 8, 16>}]} {
    %c0 = arith.constant 0 : index
    %c0_0 = arith.constant 0 : index
    %c0_1 = arith.constant 0 : index
    %0 = vector.load %arg3[%c0, %c0_0, %c0_1] : memref<1x4x54xf32, #tpu.memory_space<vmem>>, vector<1x4x54xf32>
    %1 = vector.shape_cast %0 : vector<1x4x54xf32> to vector<4x54xf32>
    %2 = arith.truncf %1 : vector<4x54xf32> to vector<4x54xbf16>
    %c0_2 = arith.constant 0 : index
    %c0_3 = arith.constant 0 : index
    %c0_4 = arith.constant 0 : index
    %3 = vector.load %arg4[%c0_2, %c0_3, %c0_4] : memref<1x2x4xbf16, #tpu.memory_space<vmem>>, vector<1x2x4xbf16>
    %4 = vector.shape_cast %3 : vector<1x2x4xbf16> to vector<2x4xbf16>
    %cst = arith.constant dense<0.000000e+00> : vector<2x54xf32>
    %5 = tpu.matmul %4, %2, %cst {dimension_numbers = #tpu.dot_dimension_numbers<[1], [0], [0], [1], [0, 0, 1, 1], [], []>} : vector<2x4xbf16>, vector<4x54xbf16>, vector<2x54xf32> -> vector<2x54xf32>
    %6 = arith.truncf %5 : vector<2x54xf32> to vector<2x54xbf16>
    %cst_5 = arith.constant 0.000000e+00 : f32
    %7 = vector.broadcast %cst_5 : f32 to vector<6x16xf32>
    %c0_6 = arith.constant 0 : index
    %c0_7 = arith.constant 0 : index
    %c0_8 = arith.constant 0 : index
    %c0_9 = arith.constant 0 : index
    %8 = vector.load %arg5[%c0_6, %c0_7, %c0_8, %c0_9] : memref<1x39x6x2xbf16, #tpu.memory_space<vmem>>, vector<1x1x6x2xbf16>
    %9 = vector.shape_cast %8 : vector<1x1x6x2xbf16> to vector<6x2xbf16>
    %10 = vector.extract_strided_slice %6 {offsets = [0, 0], sizes = [2, 16], strides = [1, 1]} : vector<2x54xbf16> to vector<2x16xbf16>
    %cst_10 = arith.constant dense<0.000000e+00> : vector<6x16xf32>
    %11 = tpu.matmul %9, %10, %cst_10 {dimension_numbers = #tpu.dot_dimension_numbers<[1], [0], [0], [1], [0, 0, 1, 1], [], []>} : vector<6x2xbf16>, vector<2x16xbf16>, vector<6x16xf32> -> vector<6x16xf32>
    %12 = arith.addf %7, %11 : vector<6x16xf32>
    %c0_11 = arith.constant 0 : index
    %c1 = arith.constant 1 : index
    %c0_12 = arith.constant 0 : index
    %c0_13 = arith.constant 0 : index
    %13 = vector.load %arg5[%c0_11, %c1, %c0_12, %c0_13] : memref<1x39x6x2xbf16, #tpu.memory_space<vmem>>, vector<1x1x6x2xbf16>
    %14 = vector.shape_cast %13 : vector<1x1x6x2xbf16> to vector<6x2xbf16>
    %15 = vector.extract_strided_slice %6 {offsets = [0, 1], sizes = [2, 16], strides = [1, 1]} : vector<2x54xbf16> to vector<2x16xbf16>
    %cst_14 = arith.constant dense<0.000000e+00> : vector<6x16xf32>
    %16 = tpu.matmul %14, %15, %cst_14 {dimension_numbers = #tpu.dot_dimension_numbers<[1], [0], [0], [1], [0, 0, 1, 1], [], []>} : vector<6x2xbf16>, vector<2x16xbf16>, vector<6x16xf32> -> vector<6x16xf32>
    %17 = arith.addf %12, %16 : vector<6x16xf32>
    %c0_15 = arith.constant 0 : index
    %c2 = arith.constant 2 : index
    %c0_16 = arith.constant 0 : index
    %c0_17 = arith.constant 0 : index
    %18 = vector.load %arg5[%c0_15, %c2, %c0_16, %c0_17] : memref<1x39x6x2xbf16, #tpu.memory_space<vmem>>, vector<1x1x6x2xbf16>
    %19 = vector.shape_cast %18 : vector<1x1x6x2xbf16> to vector<6x2xbf16>
    %20 = vector.extract_strided_slice %6 {offsets = [0, 2], sizes = [2, 16], strides = [1, 1]} : vector<2x54xbf16> to vector<2x16xbf16>
    %cst_18 = arith.constant dense<0.000000e+00> : vector<6x16xf32>
    %21 = tpu.matmul %19, %20, %cst_18 {dimension_numbers = #tpu.dot_dimension_numbers<[1], [0], [0], [1], [0, 0, 1, 1], [], []>} : vector<6x2xbf16>, vector<2x16xbf16>, vector<6x16xf32> -> vector<6x16xf32>
    %22 = arith.addf %17, %21 : vector<6x16xf32>
    %c0_19 = arith.constant 0 : index
    %c3 = arith.constant 3 : index
    %c0_20 = arith.constant 0 : index
    %c0_21 = arith.constant 0 : index
    %23 = vector.load %arg5[%c0_19, %c3, %c0_20, %c0_21] : memref<1x39x6x2xbf16, #tpu.memory_space<vmem>>, vector<1x1x6x2xbf16>
    %24 = vector.shape_cast %23 : vector<1x1x6x2xbf16> to vector<6x2xbf16>
    %25 = vector.extract_strided_slice %6 {offsets = [0, 3], sizes = [2, 16], strides = [1, 1]} : vector<2x54xbf16> to vector<2x16xbf16>
    %cst_22 = arith.constant dense<0.000000e+00> : vector<6x16xf32>
    %26 = tpu.matmul %24, %25, %cst_22 {dimension_numbers = #tpu.dot_dimension_numbers<[1], [0], [0], [1], [0, 0, 1, 1], [], []>} : vector<6x2xbf16>, vector<2x16xbf16>, vector<6x16xf32> -> vector<6x16xf32>
    %27 = arith.addf %22, %26 : vector<6x16xf32>
    %c0_23 = arith.constant 0 : index
    %c4 = arith.constant 4 : index
    %c0_24 = arith.constant 0 : index
    %c0_25 = arith.constant 0 : index
    %28 = vector.load %arg5[%c0_23, %c4, %c0_24, %c0_25] : memref<1x39x6x2xbf16, #tpu.memory_space<vmem>>, vector<1x1x6x2xbf16>
    %29 = vector.shape_cast %28 : vector<1x1x6x2xbf16> to vector<6x2xbf16>
    %30 = vector.extract_strided_slice %6 {offsets = [0, 4], sizes = [2, 16], strides = [1, 1]} : vector<2x54xbf16> to vector<2x16xbf16>
    %cst_26 = arith.constant dense<0.000000e+00> : vector<6x16xf32>
    %31 = tpu.matmul %29, %30, %cst_26 {dimension_numbers = #tpu.dot_dimension_numbers<[1], [0], [0], [1], [0, 0, 1, 1], [], []>} : vector<6x2xbf16>, vector<2x16xbf16>, vector<6x16xf32> -> vector<6x16xf32>
    %32 = arith.addf %27, %31 : vector<6x16xf32>
    %c0_27 = arith.constant 0 : index
    %c5 = arith.constant 5 : index
    %c0_28 = arith.constant 0 : index
    %c0_29 = arith.constant 0 : index
    %33 = vector.load %arg5[%c0_27, %c5, %c0_28, %c0_29] : memref<1x39x6x2xbf16, #tpu.memory_space<vmem>>, vector<1x1x6x2xbf16>
    %34 = vector.shape_cast %33 : vector<1x1x6x2xbf16> to vector<6x2xbf16>
    %35 = vector.extract_strided_slice %6 {offsets = [0, 5], sizes = [2, 16], strides = [1, 1]} : vector<2x54xbf16> to vector<2x16xbf16>
    %cst_30 = arith.constant dense<0.000000e+00> : vector<6x16xf32>
    %36 = tpu.matmul %34, %35, %cst_30 {dimension_numbers = #tpu.dot_dimension_numbers<[1], [0], [0], [1], [0, 0, 1, 1], [], []>} : vector<6x2xbf16>, vector<2x16xbf16>, vector<6x16xf32> -> vector<6x16xf32>
    %37 = arith.addf %32, %36 : vector<6x16xf32>
    %c0_31 = arith.constant 0 : index
    %c6 = arith.constant 6 : index
    %c0_32 = arith.constant 0 : index
    %c0_33 = arith.constant 0 : index
    %38 = vector.load %arg5[%c0_31, %c6, %c0_32, %c0_33] : memref<1x39x6x2xbf16, #tpu.memory_space<vmem>>, vector<1x1x6x2xbf16>
    %39 = vector.shape_cast %38 : vector<1x1x6x2xbf16> to vector<6x2xbf16>
    %40 = vector.extract_strided_slice %6 {offsets = [0, 6], sizes = [2, 16], strides = [1, 1]} : vector<2x54xbf16> to vector<2x16xbf16>
    %cst_34 = arith.constant dense<0.000000e+00> : vector<6x16xf32>
    %41 = tpu.matmul %39, %40, %cst_34 {dimension_numbers = #tpu.dot_dimension_numbers<[1], [0], [0], [1], [0, 0, 1, 1], [], []>} : vector<6x2xbf16>, vector<2x16xbf16>, vector<6x16xf32> -> vector<6x16xf32>
    %42 = arith.addf %37, %41 : vector<6x16xf32>
    %c0_35 = arith.constant 0 : index
    %c7 = arith.constant 7 : index
    %c0_36 = arith.constant 0 : index
    %c0_37 = arith.constant 0 : index
    %43 = vector.load %arg5[%c0_35, %c7, %c0_36, %c0_37] : memref<1x39x6x2xbf16, #tpu.memory_space<vmem>>, vector<1x1x6x2xbf16>
    %44 = vector.shape_cast %43 : vector<1x1x6x2xbf16> to vector<6x2xbf16>
    %45 = vector.extract_strided_slice %6 {offsets = [0, 7], sizes = [2, 16], strides = [1, 1]} : vector<2x54xbf16> to vector<2x16xbf16>
    %cst_38 = arith.constant dense<0.000000e+00> : vector<6x16xf32>
    %46 = tpu.matmul %44, %45, %cst_38 {dimension_numbers = #tpu.dot_dimension_numbers<[1], [0], [0], [1], [0, 0, 1, 1], [], []>} : vector<6x2xbf16>, vector<2x16xbf16>, vector<6x16xf32> -> vector<6x16xf32>
    %47 = arith.addf %42, %46 : vector<6x16xf32>
    %c0_39 = arith.constant 0 : index
    %c8 = arith.constant 8 : index
    %c0_40 = arith.constant 0 : index
    %c0_41 = arith.constant 0 : index
    %48 = vector.load %arg5[%c0_39, %c8, %c0_40, %c0_41] : memref<1x39x6x2xbf16, #tpu.memory_space<vmem>>, vector<1x1x6x2xbf16>
    %49 = vector.shape_cast %48 : vector<1x1x6x2xbf16> to vector<6x2xbf16>
    %50 = vector.extract_strided_slice %6 {offsets = [0, 8], sizes = [2, 16], strides = [1, 1]} : vector<2x54xbf16> to vector<2x16xbf16>
    %cst_42 = arith.constant dense<0.000000e+00> : vector<6x16xf32>
    %51 = tpu.matmul %49, %50, %cst_42 {dimension_numbers = #tpu.dot_dimension_numbers<[1], [0], [0], [1], [0, 0, 1, 1], [], []>} : vector<6x2xbf16>, vector<2x16xbf16>, vector<6x16xf32> -> vector<6x16xf32>
    %52 = arith.addf %47, %51 : vector<6x16xf32>
    %c0_43 = arith.constant 0 : index
    %c9 = arith.constant 9 : index
    %c0_44 = arith.constant 0 : index
    %c0_45 = arith.constant 0 : index
    %53 = vector.load %arg5[%c0_43, %c9, %c0_44, %c0_45] : memref<1x39x6x2xbf16, #tpu.memory_space<vmem>>, vector<1x1x6x2xbf16>
    %54 = vector.shape_cast %53 : vector<1x1x6x2xbf16> to vector<6x2xbf16>
    %55 = vector.extract_strided_slice %6 {offsets = [0, 9], sizes = [2, 16], strides = [1, 1]} : vector<2x54xbf16> to vector<2x16xbf16>
    %cst_46 = arith.constant dense<0.000000e+00> : vector<6x16xf32>
    %56 = tpu.matmul %54, %55, %cst_46 {dimension_numbers = #tpu.dot_dimension_numbers<[1], [0], [0], [1], [0, 0, 1, 1], [], []>} : vector<6x2xbf16>, vector<2x16xbf16>, vector<6x16xf32> -> vector<6x16xf32>
    %57 = arith.addf %52, %56 : vector<6x16xf32>
    %c0_47 = arith.constant 0 : index
    %c10 = arith.constant 10 : index
    %c0_48 = arith.constant 0 : index
    %c0_49 = arith.constant 0 : index
    %58 = vector.load %arg5[%c0_47, %c10, %c0_48, %c0_49] : memref<1x39x6x2xbf16, #tpu.memory_space<vmem>>, vector<1x1x6x2xbf16>
    %59 = vector.shape_cast %58 : vector<1x1x6x2xbf16> to vector<6x2xbf16>
    %60 = vector.extract_strided_slice %6 {offsets = [0, 10], sizes = [2, 16], strides = [1, 1]} : vector<2x54xbf16> to vector<2x16xbf16>
    %cst_50 = arith.constant dense<0.000000e+00> : vector<6x16xf32>
    %61 = tpu.matmul %59, %60, %cst_50 {dimension_numbers = #tpu.dot_dimension_numbers<[1], [0], [0], [1], [0, 0, 1, 1], [], []>} : vector<6x2xbf16>, vector<2x16xbf16>, vector<6x16xf32> -> vector<6x16xf32>
    %62 = arith.addf %57, %61 : vector<6x16xf32>
    %c0_51 = arith.constant 0 : index
    %c11 = arith.constant 11 : index
    %c0_52 = arith.constant 0 : index
    %c0_53 = arith.constant 0 : index
    %63 = vector.load %arg5[%c0_51, %c11, %c0_52, %c0_53] : memref<1x39x6x2xbf16, #tpu.memory_space<vmem>>, vector<1x1x6x2xbf16>
    %64 = vector.shape_cast %63 : vector<1x1x6x2xbf16> to vector<6x2xbf16>
    %65 = vector.extract_strided_slice %6 {offsets = [0, 11], sizes = [2, 16], strides = [1, 1]} : vector<2x54xbf16> to vector<2x16xbf16>
    %cst_54 = arith.constant dense<0.000000e+00> : vector<6x16xf32>
    %66 = tpu.matmul %64, %65, %cst_54 {dimension_numbers = #tpu.dot_dimension_numbers<[1], [0], [0], [1], [0, 0, 1, 1], [], []>} : vector<6x2xbf16>, vector<2x16xbf16>, vector<6x16xf32> -> vector<6x16xf32>
    %67 = arith.addf %62, %66 : vector<6x16xf32>
    %c0_55 = arith.constant 0 : index
    %c12 = arith.constant 12 : index
    %c0_56 = arith.constant 0 : index
    %c0_57 = arith.constant 0 : index
    %68 = vector.load %arg5[%c0_55, %c12, %c0_56, %c0_57] : memref<1x39x6x2xbf16, #tpu.memory_space<vmem>>, vector<1x1x6x2xbf16>
    %69 = vector.shape_cast %68 : vector<1x1x6x2xbf16> to vector<6x2xbf16>
    %70 = vector.extract_strided_slice %6 {offsets = [0, 12], sizes = [2, 16], strides = [1, 1]} : vector<2x54xbf16> to vector<2x16xbf16>
    %cst_58 = arith.constant dense<0.000000e+00> : vector<6x16xf32>
    %71 = tpu.matmul %69, %70, %cst_58 {dimension_numbers = #tpu.dot_dimension_numbers<[1], [0], [0], [1], [0, 0, 1, 1], [], []>} : vector<6x2xbf16>, vector<2x16xbf16>, vector<6x16xf32> -> vector<6x16xf32>
    %72 = arith.addf %67, %71 : vector<6x16xf32>
    %c0_59 = arith.constant 0 : index
    %c13 = arith.constant 13 : index
    %c0_60 = arith.constant 0 : index
    %c0_61 = arith.constant 0 : index
    %73 = vector.load %arg5[%c0_59, %c13, %c0_60, %c0_61] : memref<1x39x6x2xbf16, #tpu.memory_space<vmem>>, vector<1x1x6x2xbf16>
    %74 = vector.shape_cast %73 : vector<1x1x6x2xbf16> to vector<6x2xbf16>
    %75 = vector.extract_strided_slice %6 {offsets = [0, 13], sizes = [2, 16], strides = [1, 1]} : vector<2x54xbf16> to vector<2x16xbf16>
    %cst_62 = arith.constant dense<0.000000e+00> : vector<6x16xf32>
    %76 = tpu.matmul %74, %75, %cst_62 {dimension_numbers = #tpu.dot_dimension_numbers<[1], [0], [0], [1], [0, 0, 1, 1], [], []>} : vector<6x2xbf16>, vector<2x16xbf16>, vector<6x16xf32> -> vector<6x16xf32>
    %77 = arith.addf %72, %76 : vector<6x16xf32>
    %c0_63 = arith.constant 0 : index
    %c14 = arith.constant 14 : index
    %c0_64 = arith.constant 0 : index
    %c0_65 = arith.constant 0 : index
    %78 = vector.load %arg5[%c0_63, %c14, %c0_64, %c0_65] : memref<1x39x6x2xbf16, #tpu.memory_space<vmem>>, vector<1x1x6x2xbf16>
    %79 = vector.shape_cast %78 : vector<1x1x6x2xbf16> to vector<6x2xbf16>
    %80 = vector.extract_strided_slice %6 {offsets = [0, 14], sizes = [2, 16], strides = [1, 1]} : vector<2x54xbf16> to vector<2x16xbf16>
    %cst_66 = arith.constant dense<0.000000e+00> : vector<6x16xf32>
    %81 = tpu.matmul %79, %80, %cst_66 {dimension_numbers = #tpu.dot_dimension_numbers<[1], [0], [0], [1], [0, 0, 1, 1], [], []>} : vector<6x2xbf16>, vector<2x16xbf16>, vector<6x16xf32> -> vector<6x16xf32>
    %82 = arith.addf %77, %81 : vector<6x16xf32>
    %c0_67 = arith.constant 0 : index
    %c15 = arith.constant 15 : index
    %c0_68 = arith.constant 0 : index
    %c0_69 = arith.constant 0 : index
    %83 = vector.load %arg5[%c0_67, %c15, %c0_68, %c0_69] : memref<1x39x6x2xbf16, #tpu.memory_space<vmem>>, vector<1x1x6x2xbf16>
    %84 = vector.shape_cast %83 : vector<1x1x6x2xbf16> to vector<6x2xbf16>
    %85 = vector.extract_strided_slice %6 {offsets = [0, 15], sizes = [2, 16], strides = [1, 1]} : vector<2x54xbf16> to vector<2x16xbf16>
    %cst_70 = arith.constant dense<0.000000e+00> : vector<6x16xf32>
    %86 = tpu.matmul %84, %85, %cst_70 {dimension_numbers = #tpu.dot_dimension_numbers<[1], [0], [0], [1], [0, 0, 1, 1], [], []>} : vector<6x2xbf16>, vector<2x16xbf16>, vector<6x16xf32> -> vector<6x16xf32>
    %87 = arith.addf %82, %86 : vector<6x16xf32>
    %c0_71 = arith.constant 0 : index
    %c16 = arith.constant 16 : index
    %c0_72 = arith.constant 0 : index
    %c0_73 = arith.constant 0 : index
    %88 = vector.load %arg5[%c0_71, %c16, %c0_72, %c0_73] : memref<1x39x6x2xbf16, #tpu.memory_space<vmem>>, vector<1x1x6x2xbf16>
    %89 = vector.shape_cast %88 : vector<1x1x6x2xbf16> to vector<6x2xbf16>
    %90 = vector.extract_strided_slice %6 {offsets = [0, 16], sizes = [2, 16], strides = [1, 1]} : vector<2x54xbf16> to vector<2x16xbf16>
    %cst_74 = arith.constant dense<0.000000e+00> : vector<6x16xf32>
    %91 = tpu.matmul %89, %90, %cst_74 {dimension_numbers = #tpu.dot_dimension_numbers<[1], [0], [0], [1], [0, 0, 1, 1], [], []>} : vector<6x2xbf16>, vector<2x16xbf16>, vector<6x16xf32> -> vector<6x16xf32>
    %92 = arith.addf %87, %91 : vector<6x16xf32>
    %c0_75 = arith.constant 0 : index
    %c17 = arith.constant 17 : index
    %c0_76 = arith.constant 0 : index
    %c0_77 = arith.constant 0 : index
    %93 = vector.load %arg5[%c0_75, %c17, %c0_76, %c0_77] : memref<1x39x6x2xbf16, #tpu.memory_space<vmem>>, vector<1x1x6x2xbf16>
    %94 = vector.shape_cast %93 : vector<1x1x6x2xbf16> to vector<6x2xbf16>
    %95 = vector.extract_strided_slice %6 {offsets = [0, 17], sizes = [2, 16], strides = [1, 1]} : vector<2x54xbf16> to vector<2x16xbf16>
    %cst_78 = arith.constant dense<0.000000e+00> : vector<6x16xf32>
    %96 = tpu.matmul %94, %95, %cst_78 {dimension_numbers = #tpu.dot_dimension_numbers<[1], [0], [0], [1], [0, 0, 1, 1], [], []>} : vector<6x2xbf16>, vector<2x16xbf16>, vector<6x16xf32> -> vector<6x16xf32>
    %97 = arith.addf %92, %96 : vector<6x16xf32>
    %c0_79 = arith.constant 0 : index
    %c18 = arith.constant 18 : index
    %c0_80 = arith.constant 0 : index
    %c0_81 = arith.constant 0 : index
    %98 = vector.load %arg5[%c0_79, %c18, %c0_80, %c0_81] : memref<1x39x6x2xbf16, #tpu.memory_space<vmem>>, vector<1x1x6x2xbf16>
    %99 = vector.shape_cast %98 : vector<1x1x6x2xbf16> to vector<6x2xbf16>
    %100 = vector.extract_strided_slice %6 {offsets = [0, 18], sizes = [2, 16], strides = [1, 1]} : vector<2x54xbf16> to vector<2x16xbf16>
    %cst_82 = arith.constant dense<0.000000e+00> : vector<6x16xf32>
    %101 = tpu.matmul %99, %100, %cst_82 {dimension_numbers = #tpu.dot_dimension_numbers<[1], [0], [0], [1], [0, 0, 1, 1], [], []>} : vector<6x2xbf16>, vector<2x16xbf16>, vector<6x16xf32> -> vector<6x16xf32>
    %102 = arith.addf %97, %101 : vector<6x16xf32>
    %c0_83 = arith.constant 0 : index
    %c19 = arith.constant 19 : index
    %c0_84 = arith.constant 0 : index
    %c0_85 = arith.constant 0 : index
    %103 = vector.load %arg5[%c0_83, %c19, %c0_84, %c0_85] : memref<1x39x6x2xbf16, #tpu.memory_space<vmem>>, vector<1x1x6x2xbf16>
    %104 = vector.shape_cast %103 : vector<1x1x6x2xbf16> to vector<6x2xbf16>
    %105 = vector.extract_strided_slice %6 {offsets = [0, 19], sizes = [2, 16], strides = [1, 1]} : vector<2x54xbf16> to vector<2x16xbf16>
    %cst_86 = arith.constant dense<0.000000e+00> : vector<6x16xf32>
    %106 = tpu.matmul %104, %105, %cst_86 {dimension_numbers = #tpu.dot_dimension_numbers<[1], [0], [0], [1], [0, 0, 1, 1], [], []>} : vector<6x2xbf16>, vector<2x16xbf16>, vector<6x16xf32> -> vector<6x16xf32>
    %107 = arith.addf %102, %106 : vector<6x16xf32>
    %c0_87 = arith.constant 0 : index
    %c20 = arith.constant 20 : index
    %c0_88 = arith.constant 0 : index
    %c0_89 = arith.constant 0 : index
    %108 = vector.load %arg5[%c0_87, %c20, %c0_88, %c0_89] : memref<1x39x6x2xbf16, #tpu.memory_space<vmem>>, vector<1x1x6x2xbf16>
    %109 = vector.shape_cast %108 : vector<1x1x6x2xbf16> to vector<6x2xbf16>
    %110 = vector.extract_strided_slice %6 {offsets = [0, 20], sizes = [2, 16], strides = [1, 1]} : vector<2x54xbf16> to vector<2x16xbf16>
    %cst_90 = arith.constant dense<0.000000e+00> : vector<6x16xf32>
    %111 = tpu.matmul %109, %110, %cst_90 {dimension_numbers = #tpu.dot_dimension_numbers<[1], [0], [0], [1], [0, 0, 1, 1], [], []>} : vector<6x2xbf16>, vector<2x16xbf16>, vector<6x16xf32> -> vector<6x16xf32>
    %112 = arith.addf %107, %111 : vector<6x16xf32>
    %c0_91 = arith.constant 0 : index
    %c21 = arith.constant 21 : index
    %c0_92 = arith.constant 0 : index
    %c0_93 = arith.constant 0 : index
    %113 = vector.load %arg5[%c0_91, %c21, %c0_92, %c0_93] : memref<1x39x6x2xbf16, #tpu.memory_space<vmem>>, vector<1x1x6x2xbf16>
    %114 = vector.shape_cast %113 : vector<1x1x6x2xbf16> to vector<6x2xbf16>
    %115 = vector.extract_strided_slice %6 {offsets = [0, 21], sizes = [2, 16], strides = [1, 1]} : vector<2x54xbf16> to vector<2x16xbf16>
    %cst_94 = arith.constant dense<0.000000e+00> : vector<6x16xf32>
    %116 = tpu.matmul %114, %115, %cst_94 {dimension_numbers = #tpu.dot_dimension_numbers<[1], [0], [0], [1], [0, 0, 1, 1], [], []>} : vector<6x2xbf16>, vector<2x16xbf16>, vector<6x16xf32> -> vector<6x16xf32>
    %117 = arith.addf %112, %116 : vector<6x16xf32>
    %c0_95 = arith.constant 0 : index
    %c22 = arith.constant 22 : index
    %c0_96 = arith.constant 0 : index
    %c0_97 = arith.constant 0 : index
    %118 = vector.load %arg5[%c0_95, %c22, %c0_96, %c0_97] : memref<1x39x6x2xbf16, #tpu.memory_space<vmem>>, vector<1x1x6x2xbf16>
    %119 = vector.shape_cast %118 : vector<1x1x6x2xbf16> to vector<6x2xbf16>
    %120 = vector.extract_strided_slice %6 {offsets = [0, 22], sizes = [2, 16], strides = [1, 1]} : vector<2x54xbf16> to vector<2x16xbf16>
    %cst_98 = arith.constant dense<0.000000e+00> : vector<6x16xf32>
    %121 = tpu.matmul %119, %120, %cst_98 {dimension_numbers = #tpu.dot_dimension_numbers<[1], [0], [0], [1], [0, 0, 1, 1], [], []>} : vector<6x2xbf16>, vector<2x16xbf16>, vector<6x16xf32> -> vector<6x16xf32>
    %122 = arith.addf %117, %121 : vector<6x16xf32>
    %c0_99 = arith.constant 0 : index
    %c23 = arith.constant 23 : index
    %c0_100 = arith.constant 0 : index
    %c0_101 = arith.constant 0 : index
    %123 = vector.load %arg5[%c0_99, %c23, %c0_100, %c0_101] : memref<1x39x6x2xbf16, #tpu.memory_space<vmem>>, vector<1x1x6x2xbf16>
    %124 = vector.shape_cast %123 : vector<1x1x6x2xbf16> to vector<6x2xbf16>
    %125 = vector.extract_strided_slice %6 {offsets = [0, 23], sizes = [2, 16], strides = [1, 1]} : vector<2x54xbf16> to vector<2x16xbf16>
    %cst_102 = arith.constant dense<0.000000e+00> : vector<6x16xf32>
    %126 = tpu.matmul %124, %125, %cst_102 {dimension_numbers = #tpu.dot_dimension_numbers<[1], [0], [0], [1], [0, 0, 1, 1], [], []>} : vector<6x2xbf16>, vector<2x16xbf16>, vector<6x16xf32> -> vector<6x16xf32>
    %127 = arith.addf %122, %126 : vector<6x16xf32>
    %c0_103 = arith.constant 0 : index
    %c24 = arith.constant 24 : index
    %c0_104 = arith.constant 0 : index
    %c0_105 = arith.constant 0 : index
    %128 = vector.load %arg5[%c0_103, %c24, %c0_104, %c0_105] : memref<1x39x6x2xbf16, #tpu.memory_space<vmem>>, vector<1x1x6x2xbf16>
    %129 = vector.shape_cast %128 : vector<1x1x6x2xbf16> to vector<6x2xbf16>
    %130 = vector.extract_strided_slice %6 {offsets = [0, 24], sizes = [2, 16], strides = [1, 1]} : vector<2x54xbf16> to vector<2x16xbf16>
    %cst_106 = arith.constant dense<0.000000e+00> : vector<6x16xf32>
    %131 = tpu.matmul %129, %130, %cst_106 {dimension_numbers = #tpu.dot_dimension_numbers<[1], [0], [0], [1], [0, 0, 1, 1], [], []>} : vector<6x2xbf16>, vector<2x16xbf16>, vector<6x16xf32> -> vector<6x16xf32>
    %132 = arith.addf %127, %131 : vector<6x16xf32>
    %c0_107 = arith.constant 0 : index
    %c25 = arith.constant 25 : index
    %c0_108 = arith.constant 0 : index
    %c0_109 = arith.constant 0 : index
    %133 = vector.load %arg5[%c0_107, %c25, %c0_108, %c0_109] : memref<1x39x6x2xbf16, #tpu.memory_space<vmem>>, vector<1x1x6x2xbf16>
    %134 = vector.shape_cast %133 : vector<1x1x6x2xbf16> to vector<6x2xbf16>
    %135 = vector.extract_strided_slice %6 {offsets = [0, 25], sizes = [2, 16], strides = [1, 1]} : vector<2x54xbf16> to vector<2x16xbf16>
    %cst_110 = arith.constant dense<0.000000e+00> : vector<6x16xf32>
    %136 = tpu.matmul %134, %135, %cst_110 {dimension_numbers = #tpu.dot_dimension_numbers<[1], [0], [0], [1], [0, 0, 1, 1], [], []>} : vector<6x2xbf16>, vector<2x16xbf16>, vector<6x16xf32> -> vector<6x16xf32>
    %137 = arith.addf %132, %136 : vector<6x16xf32>
    %c0_111 = arith.constant 0 : index
    %c26 = arith.constant 26 : index
    %c0_112 = arith.constant 0 : index
    %c0_113 = arith.constant 0 : index
    %138 = vector.load %arg5[%c0_111, %c26, %c0_112, %c0_113] : memref<1x39x6x2xbf16, #tpu.memory_space<vmem>>, vector<1x1x6x2xbf16>
    %139 = vector.shape_cast %138 : vector<1x1x6x2xbf16> to vector<6x2xbf16>
    %140 = vector.extract_strided_slice %6 {offsets = [0, 26], sizes = [2, 16], strides = [1, 1]} : vector<2x54xbf16> to vector<2x16xbf16>
    %cst_114 = arith.constant dense<0.000000e+00> : vector<6x16xf32>
    %141 = tpu.matmul %139, %140, %cst_114 {dimension_numbers = #tpu.dot_dimension_numbers<[1], [0], [0], [1], [0, 0, 1, 1], [], []>} : vector<6x2xbf16>, vector<2x16xbf16>, vector<6x16xf32> -> vector<6x16xf32>
    %142 = arith.addf %137, %141 : vector<6x16xf32>
    %c0_115 = arith.constant 0 : index
    %c27 = arith.constant 27 : index
    %c0_116 = arith.constant 0 : index
    %c0_117 = arith.constant 0 : index
    %143 = vector.load %arg5[%c0_115, %c27, %c0_116, %c0_117] : memref<1x39x6x2xbf16, #tpu.memory_space<vmem>>, vector<1x1x6x2xbf16>
    %144 = vector.shape_cast %143 : vector<1x1x6x2xbf16> to vector<6x2xbf16>
    %145 = vector.extract_strided_slice %6 {offsets = [0, 27], sizes = [2, 16], strides = [1, 1]} : vector<2x54xbf16> to vector<2x16xbf16>
    %cst_118 = arith.constant dense<0.000000e+00> : vector<6x16xf32>
    %146 = tpu.matmul %144, %145, %cst_118 {dimension_numbers = #tpu.dot_dimension_numbers<[1], [0], [0], [1], [0, 0, 1, 1], [], []>} : vector<6x2xbf16>, vector<2x16xbf16>, vector<6x16xf32> -> vector<6x16xf32>
    %147 = arith.addf %142, %146 : vector<6x16xf32>
    %c0_119 = arith.constant 0 : index
    %c28 = arith.constant 28 : index
    %c0_120 = arith.constant 0 : index
    %c0_121 = arith.constant 0 : index
    %148 = vector.load %arg5[%c0_119, %c28, %c0_120, %c0_121] : memref<1x39x6x2xbf16, #tpu.memory_space<vmem>>, vector<1x1x6x2xbf16>
    %149 = vector.shape_cast %148 : vector<1x1x6x2xbf16> to vector<6x2xbf16>
    %150 = vector.extract_strided_slice %6 {offsets = [0, 28], sizes = [2, 16], strides = [1, 1]} : vector<2x54xbf16> to vector<2x16xbf16>
    %cst_122 = arith.constant dense<0.000000e+00> : vector<6x16xf32>
    %151 = tpu.matmul %149, %150, %cst_122 {dimension_numbers = #tpu.dot_dimension_numbers<[1], [0], [0], [1], [0, 0, 1, 1], [], []>} : vector<6x2xbf16>, vector<2x16xbf16>, vector<6x16xf32> -> vector<6x16xf32>
    %152 = arith.addf %147, %151 : vector<6x16xf32>
    %c0_123 = arith.constant 0 : index
    %c29 = arith.constant 29 : index
    %c0_124 = arith.constant 0 : index
    %c0_125 = arith.constant 0 : index
    %153 = vector.load %arg5[%c0_123, %c29, %c0_124, %c0_125] : memref<1x39x6x2xbf16, #tpu.memory_space<vmem>>, vector<1x1x6x2xbf16>
    %154 = vector.shape_cast %153 : vector<1x1x6x2xbf16> to vector<6x2xbf16>
    %155 = vector.extract_strided_slice %6 {offsets = [0, 29], sizes = [2, 16], strides = [1, 1]} : vector<2x54xbf16> to vector<2x16xbf16>
    %cst_126 = arith.constant dense<0.000000e+00> : vector<6x16xf32>
    %156 = tpu.matmul %154, %155, %cst_126 {dimension_numbers = #tpu.dot_dimension_numbers<[1], [0], [0], [1], [0, 0, 1, 1], [], []>} : vector<6x2xbf16>, vector<2x16xbf16>, vector<6x16xf32> -> vector<6x16xf32>
    %157 = arith.addf %152, %156 : vector<6x16xf32>
    %c0_127 = arith.constant 0 : index
    %c30 = arith.constant 30 : index
    %c0_128 = arith.constant 0 : index
    %c0_129 = arith.constant 0 : index
    %158 = vector.load %arg5[%c0_127, %c30, %c0_128, %c0_129] : memref<1x39x6x2xbf16, #tpu.memory_space<vmem>>, vector<1x1x6x2xbf16>
    %159 = vector.shape_cast %158 : vector<1x1x6x2xbf16> to vector<6x2xbf16>
    %160 = vector.extract_strided_slice %6 {offsets = [0, 30], sizes = [2, 16], strides = [1, 1]} : vector<2x54xbf16> to vector<2x16xbf16>
    %cst_130 = arith.constant dense<0.000000e+00> : vector<6x16xf32>
    %161 = tpu.matmul %159, %160, %cst_130 {dimension_numbers = #tpu.dot_dimension_numbers<[1], [0], [0], [1], [0, 0, 1, 1], [], []>} : vector<6x2xbf16>, vector<2x16xbf16>, vector<6x16xf32> -> vector<6x16xf32>
    %162 = arith.addf %157, %161 : vector<6x16xf32>
    %c0_131 = arith.constant 0 : index
    %c31 = arith.constant 31 : index
    %c0_132 = arith.constant 0 : index
    %c0_133 = arith.constant 0 : index
    %163 = vector.load %arg5[%c0_131, %c31, %c0_132, %c0_133] : memref<1x39x6x2xbf16, #tpu.memory_space<vmem>>, vector<1x1x6x2xbf16>
    %164 = vector.shape_cast %163 : vector<1x1x6x2xbf16> to vector<6x2xbf16>
    %165 = vector.extract_strided_slice %6 {offsets = [0, 31], sizes = [2, 16], strides = [1, 1]} : vector<2x54xbf16> to vector<2x16xbf16>
    %cst_134 = arith.constant dense<0.000000e+00> : vector<6x16xf32>
    %166 = tpu.matmul %164, %165, %cst_134 {dimension_numbers = #tpu.dot_dimension_numbers<[1], [0], [0], [1], [0, 0, 1, 1], [], []>} : vector<6x2xbf16>, vector<2x16xbf16>, vector<6x16xf32> -> vector<6x16xf32>
    %167 = arith.addf %162, %166 : vector<6x16xf32>
    %c0_135 = arith.constant 0 : index
    %c32 = arith.constant 32 : index
    %c0_136 = arith.constant 0 : index
    %c0_137 = arith.constant 0 : index
    %168 = vector.load %arg5[%c0_135, %c32, %c0_136, %c0_137] : memref<1x39x6x2xbf16, #tpu.memory_space<vmem>>, vector<1x1x6x2xbf16>
    %169 = vector.shape_cast %168 : vector<1x1x6x2xbf16> to vector<6x2xbf16>
    %170 = vector.extract_strided_slice %6 {offsets = [0, 32], sizes = [2, 16], strides = [1, 1]} : vector<2x54xbf16> to vector<2x16xbf16>
    %cst_138 = arith.constant dense<0.000000e+00> : vector<6x16xf32>
    %171 = tpu.matmul %169, %170, %cst_138 {dimension_numbers = #tpu.dot_dimension_numbers<[1], [0], [0], [1], [0, 0, 1, 1], [], []>} : vector<6x2xbf16>, vector<2x16xbf16>, vector<6x16xf32> -> vector<6x16xf32>
    %172 = arith.addf %167, %171 : vector<6x16xf32>
    %c0_139 = arith.constant 0 : index
    %c33 = arith.constant 33 : index
    %c0_140 = arith.constant 0 : index
    %c0_141 = arith.constant 0 : index
    %173 = vector.load %arg5[%c0_139, %c33, %c0_140, %c0_141] : memref<1x39x6x2xbf16, #tpu.memory_space<vmem>>, vector<1x1x6x2xbf16>
    %174 = vector.shape_cast %173 : vector<1x1x6x2xbf16> to vector<6x2xbf16>
    %175 = vector.extract_strided_slice %6 {offsets = [0, 33], sizes = [2, 16], strides = [1, 1]} : vector<2x54xbf16> to vector<2x16xbf16>
    %cst_142 = arith.constant dense<0.000000e+00> : vector<6x16xf32>
    %176 = tpu.matmul %174, %175, %cst_142 {dimension_numbers = #tpu.dot_dimension_numbers<[1], [0], [0], [1], [0, 0, 1, 1], [], []>} : vector<6x2xbf16>, vector<2x16xbf16>, vector<6x16xf32> -> vector<6x16xf32>
    %177 = arith.addf %172, %176 : vector<6x16xf32>
    %c0_143 = arith.constant 0 : index
    %c34 = arith.constant 34 : index
    %c0_144 = arith.constant 0 : index
    %c0_145 = arith.constant 0 : index
    %178 = vector.load %arg5[%c0_143, %c34, %c0_144, %c0_145] : memref<1x39x6x2xbf16, #tpu.memory_space<vmem>>, vector<1x1x6x2xbf16>
    %179 = vector.shape_cast %178 : vector<1x1x6x2xbf16> to vector<6x2xbf16>
    %180 = vector.extract_strided_slice %6 {offsets = [0, 34], sizes = [2, 16], strides = [1, 1]} : vector<2x54xbf16> to vector<2x16xbf16>
    %cst_146 = arith.constant dense<0.000000e+00> : vector<6x16xf32>
    %181 = tpu.matmul %179, %180, %cst_146 {dimension_numbers = #tpu.dot_dimension_numbers<[1], [0], [0], [1], [0, 0, 1, 1], [], []>} : vector<6x2xbf16>, vector<2x16xbf16>, vector<6x16xf32> -> vector<6x16xf32>
    %182 = arith.addf %177, %181 : vector<6x16xf32>
    %c0_147 = arith.constant 0 : index
    %c35 = arith.constant 35 : index
    %c0_148 = arith.constant 0 : index
    %c0_149 = arith.constant 0 : index
    %183 = vector.load %arg5[%c0_147, %c35, %c0_148, %c0_149] : memref<1x39x6x2xbf16, #tpu.memory_space<vmem>>, vector<1x1x6x2xbf16>
    %184 = vector.shape_cast %183 : vector<1x1x6x2xbf16> to vector<6x2xbf16>
    %185 = vector.extract_strided_slice %6 {offsets = [0, 35], sizes = [2, 16], strides = [1, 1]} : vector<2x54xbf16> to vector<2x16xbf16>
    %cst_150 = arith.constant dense<0.000000e+00> : vector<6x16xf32>
    %186 = tpu.matmul %184, %185, %cst_150 {dimension_numbers = #tpu.dot_dimension_numbers<[1], [0], [0], [1], [0, 0, 1, 1], [], []>} : vector<6x2xbf16>, vector<2x16xbf16>, vector<6x16xf32> -> vector<6x16xf32>
    %187 = arith.addf %182, %186 : vector<6x16xf32>
    %c0_151 = arith.constant 0 : index
    %c36 = arith.constant 36 : index
    %c0_152 = arith.constant 0 : index
    %c0_153 = arith.constant 0 : index
    %188 = vector.load %arg5[%c0_151, %c36, %c0_152, %c0_153] : memref<1x39x6x2xbf16, #tpu.memory_space<vmem>>, vector<1x1x6x2xbf16>
    %189 = vector.shape_cast %188 : vector<1x1x6x2xbf16> to vector<6x2xbf16>
    %190 = vector.extract_strided_slice %6 {offsets = [0, 36], sizes = [2, 16], strides = [1, 1]} : vector<2x54xbf16> to vector<2x16xbf16>
    %cst_154 = arith.constant dense<0.000000e+00> : vector<6x16xf32>
    %191 = tpu.matmul %189, %190, %cst_154 {dimension_numbers = #tpu.dot_dimension_numbers<[1], [0], [0], [1], [0, 0, 1, 1], [], []>} : vector<6x2xbf16>, vector<2x16xbf16>, vector<6x16xf32> -> vector<6x16xf32>
    %192 = arith.addf %187, %191 : vector<6x16xf32>
    %c0_155 = arith.constant 0 : index
    %c37 = arith.constant 37 : index
    %c0_156 = arith.constant 0 : index
    %c0_157 = arith.constant 0 : index
    %193 = vector.load %arg5[%c0_155, %c37, %c0_156, %c0_157] : memref<1x39x6x2xbf16, #tpu.memory_space<vmem>>, vector<1x1x6x2xbf16>
    %194 = vector.shape_cast %193 : vector<1x1x6x2xbf16> to vector<6x2xbf16>
    %195 = vector.extract_strided_slice %6 {offsets = [0, 37], sizes = [2, 16], strides = [1, 1]} : vector<2x54xbf16> to vector<2x16xbf16>
    %cst_158 = arith.constant dense<0.000000e+00> : vector<6x16xf32>
    %196 = tpu.matmul %194, %195, %cst_158 {dimension_numbers = #tpu.dot_dimension_numbers<[1], [0], [0], [1], [0, 0, 1, 1], [], []>} : vector<6x2xbf16>, vector<2x16xbf16>, vector<6x16xf32> -> vector<6x16xf32>
    %197 = arith.addf %192, %196 : vector<6x16xf32>
    %c0_159 = arith.constant 0 : index
    %c38 = arith.constant 38 : index
    %c0_160 = arith.constant 0 : index
    %c0_161 = arith.constant 0 : index
    %198 = vector.load %arg5[%c0_159, %c38, %c0_160, %c0_161] : memref<1x39x6x2xbf16, #tpu.memory_space<vmem>>, vector<1x1x6x2xbf16>
    %199 = vector.shape_cast %198 : vector<1x1x6x2xbf16> to vector<6x2xbf16>
    %200 = vector.extract_strided_slice %6 {offsets = [0, 38], sizes = [2, 16], strides = [1, 1]} : vector<2x54xbf16> to vector<2x16xbf16>
    %cst_162 = arith.constant dense<0.000000e+00> : vector<6x16xf32>
    %201 = tpu.matmul %199, %200, %cst_162 {dimension_numbers = #tpu.dot_dimension_numbers<[1], [0], [0], [1], [0, 0, 1, 1], [], []>} : vector<6x2xbf16>, vector<2x16xbf16>, vector<6x16xf32> -> vector<6x16xf32>
    %202 = arith.addf %197, %201 : vector<6x16xf32>
    %203 = vector.extract_strided_slice %1 {offsets = [0, 19], sizes = [4, 16], strides = [1, 1]} : vector<4x54xf32> to vector<4x16xf32>
    %204 = vector.extract_strided_slice %1 {offsets = [0, 18], sizes = [4, 16], strides = [1, 1]} : vector<4x54xf32> to vector<4x16xf32>
    %205 = vector.extract_strided_slice %1 {offsets = [0, 20], sizes = [4, 16], strides = [1, 1]} : vector<4x54xf32> to vector<4x16xf32>
    %206 = tpu.iota {dimensions = array<i32: 1>} : vector<4x16xi32>
    %c0_i32 = arith.constant 0 : i32
    %207 = vector.broadcast %c0_i32 : i32 to vector<4x16xi32>
    %208 = arith.cmpi sgt, %206, %207 : vector<4x16xi32>
    %cst_163 = arith.constant 0xFF800000 : f32
    %209 = vector.broadcast %cst_163 : f32 to vector<4x16xf32>
    %210 = arith.select %208, %204, %209 : vector<4x16xi1>, vector<4x16xf32>
    %c15_i32 = arith.constant 15 : i32
    %211 = vector.broadcast %c15_i32 : i32 to vector<4x16xi32>
    %212 = arith.cmpi slt, %206, %211 : vector<4x16xi32>
    %cst_164 = arith.constant 0xFF800000 : f32
    %213 = vector.broadcast %cst_164 : f32 to vector<4x16xf32>
    %214 = arith.select %212, %205, %213 : vector<4x16xi1>, vector<4x16xf32>
    %215 = arith.maximumf %210, %214 : vector<4x16xf32>
    %216 = arith.maximumf %203, %215 : vector<4x16xf32>
    %c0_165 = arith.constant 0 : index
    %c0_166 = arith.constant 0 : index
    %c0_167 = arith.constant 0 : index
    %217 = vector.load %arg6[%c0_165, %c0_166, %c0_167] : memref<1x2x4xbf16, #tpu.memory_space<vmem>>, vector<1x2x4xbf16>
    %218 = vector.shape_cast %217 : vector<1x2x4xbf16> to vector<2x4xbf16>
    %219 = arith.truncf %216 : vector<4x16xf32> to vector<4x16xbf16>
    %cst_168 = arith.constant dense<0.000000e+00> : vector<2x16xf32>
    %220 = tpu.matmul %218, %219, %cst_168 {dimension_numbers = #tpu.dot_dimension_numbers<[1], [0], [0], [1], [0, 0, 1, 1], [], []>} : vector<2x4xbf16>, vector<4x16xbf16>, vector<2x16xf32> -> vector<2x16xf32>
    %c0_169 = arith.constant 0 : index
    %c0_170 = arith.constant 0 : index
    %c0_171 = arith.constant 0 : index
    %221 = vector.load %arg7[%c0_169, %c0_170, %c0_171] : memref<1x8x1xf32, #tpu.memory_space<vmem>>, vector<1x8x1xf32>
    %222 = vector.shape_cast %221 : vector<1x8x1xf32> to vector<8x1xf32>
    %c0_172 = arith.constant 0 : index
    %c0_173 = arith.constant 0 : index
    %c0_174 = arith.constant 0 : index
    %223 = vector.load %arg8[%c0_172, %c0_173, %c0_174] : memref<1x8x1xf32, #tpu.memory_space<vmem>>, vector<1x8x1xf32>
    %224 = vector.shape_cast %223 : vector<1x8x1xf32> to vector<8x1xf32>
    %225 = vector.extract_strided_slice %222 {offsets = [0, 0], sizes = [6, 1], strides = [1, 1]} : vector<8x1xf32> to vector<6x1xf32>
    %226 = vector.broadcast %225 : vector<6x1xf32> to vector<6x16xf32>
    %227 = arith.mulf %202, %226 : vector<6x16xf32>
    %228 = vector.extract_strided_slice %224 {offsets = [0, 0], sizes = [6, 1], strides = [1, 1]} : vector<8x1xf32> to vector<6x1xf32>
    %229 = vector.broadcast %228 : vector<6x1xf32> to vector<6x16xf32>
    %230 = arith.addf %227, %229 : vector<6x16xf32>
    %cst_175 = arith.constant 0.000000e+00 : f32
    %231 = vector.broadcast %cst_175 : f32 to vector<6x16xf32>
    %232 = arith.maximumf %230, %231 : vector<6x16xf32>
    %c0_176 = arith.constant 0 : index
    %c0_177 = arith.constant 0 : index
    %c0_178 = arith.constant 0 : index
    %233 = vector.load %arg9[%c0_176, %c0_177, %c0_178] : memref<1x8x16xf32, #tpu.memory_space<vmem>>, vector<1x6x16xf32>
    %234 = vector.shape_cast %233 : vector<1x6x16xf32> to vector<6x16xf32>
    %235 = vector.shape_cast %232 : vector<6x16xf32> to vector<1x6x16xf32>
    tpu.vector_store %arg9[%c0_176, %c0_177, %c0_178], %235 {strides = array<i32>} : memref<1x8x16xf32, #tpu.memory_space<vmem>>, vector<1x6x16xf32>,
    %236 = vector.extract_strided_slice %222 {offsets = [6, 0], sizes = [2, 1], strides = [1, 1]} : vector<8x1xf32> to vector<2x1xf32>
    %237 = vector.broadcast %236 : vector<2x1xf32> to vector<2x16xf32>
    %238 = arith.mulf %220, %237 : vector<2x16xf32>
    %239 = vector.extract_strided_slice %224 {offsets = [6, 0], sizes = [2, 1], strides = [1, 1]} : vector<8x1xf32> to vector<2x1xf32>
    %240 = vector.broadcast %239 : vector<2x1xf32> to vector<2x16xf32>
    %241 = arith.addf %238, %240 : vector<2x16xf32>
    %cst_179 = arith.constant 0.000000e+00 : f32
    %242 = vector.broadcast %cst_179 : f32 to vector<2x16xf32>
    %243 = arith.maximumf %241, %242 : vector<2x16xf32>
    %c0_180 = arith.constant 0 : index
    %c6_181 = arith.constant 6 : index
    %c0_182 = arith.constant 0 : index
    %244 = vector.load %arg9[%c0_180, %c6_181, %c0_182] : memref<1x8x16xf32, #tpu.memory_space<vmem>>, vector<1x2x16xf32>
    %245 = vector.shape_cast %244 : vector<1x2x16xf32> to vector<2x16xf32>
    %246 = vector.shape_cast %243 : vector<2x16xf32> to vector<1x2x16xf32>
    tpu.vector_store %arg9[%c0_180, %c6_181, %c0_182], %246 {strides = array<i32>} : memref<1x8x16xf32, #tpu.memory_space<vmem>>, vector<1x2x16xf32>,
    return
  }
  func.func @transform_0(%arg0: i32, %arg1: i32, %arg2: i32) -> (i32, i32, i32) {
    %c0_i32 = arith.constant 0 : i32
    %c0_i32_0 = arith.constant 0 : i32
    %c0_i32_1 = arith.constant 0 : i32
    return %arg2, %c0_i32, %c0_i32_0 : i32, i32, i32
  }
  func.func @transform_1(%arg0: i32, %arg1: i32, %arg2: i32) -> (i32, i32, i32) {
    %c4_i32 = arith.constant 4 : i32
    %0 = arith.muli %arg0, %c4_i32 : i32
    %1 = arith.addi %0, %arg1 : i32
    %c0_i32 = arith.constant 0 : i32
    %c0_i32_0 = arith.constant 0 : i32
    %c0_i32_1 = arith.constant 0 : i32
    return %1, %c0_i32, %c0_i32_0 : i32, i32, i32
  }
  func.func @transform_2(%arg0: i32, %arg1: i32, %arg2: i32) -> (i32, i32, i32, i32) {
    %c4_i32 = arith.constant 4 : i32
    %0 = arith.muli %arg0, %c4_i32 : i32
    %1 = arith.addi %0, %arg1 : i32
    %c0_i32 = arith.constant 0 : i32
    %c0_i32_0 = arith.constant 0 : i32
    %c0_i32_1 = arith.constant 0 : i32
    %c0_i32_2 = arith.constant 0 : i32
    return %1, %c0_i32, %c0_i32_0, %c0_i32_1 : i32, i32, i32, i32
  }
  func.func @transform_3(%arg0: i32, %arg1: i32, %arg2: i32) -> (i32, i32, i32) {
    %c4_i32 = arith.constant 4 : i32
    %0 = arith.muli %arg0, %c4_i32 : i32
    %1 = arith.addi %0, %arg1 : i32
    %c0_i32 = arith.constant 0 : i32
    %c0_i32_0 = arith.constant 0 : i32
    %c0_i32_1 = arith.constant 0 : i32
    return %1, %c0_i32, %c0_i32_0 : i32, i32, i32
  }
  func.func @transform_4(%arg0: i32, %arg1: i32, %arg2: i32) -> (i32, i32, i32) {
    %c4_i32 = arith.constant 4 : i32
    %0 = arith.muli %arg0, %c4_i32 : i32
    %1 = arith.addi %0, %arg1 : i32
    %c0_i32 = arith.constant 0 : i32
    %c0_i32_0 = arith.constant 0 : i32
    %c0_i32_1 = arith.constant 0 : i32
    return %1, %c0_i32, %c0_i32_0 : i32, i32, i32
  }
  func.func @transform_5(%arg0: i32, %arg1: i32, %arg2: i32) -> (i32, i32, i32) {
    %c4_i32 = arith.constant 4 : i32
    %0 = arith.muli %arg0, %c4_i32 : i32
    %1 = arith.addi %0, %arg1 : i32
    %c0_i32 = arith.constant 0 : i32
    %c0_i32_0 = arith.constant 0 : i32
    %c0_i32_1 = arith.constant 0 : i32
    return %1, %c0_i32, %c0_i32_0 : i32, i32, i32
  }
  func.func @transform_6(%arg0: i32, %arg1: i32, %arg2: i32) -> (i32, i32, i32) {
    %c4_i32 = arith.constant 4 : i32
    %0 = arith.muli %arg0, %c4_i32 : i32
    %1 = arith.addi %0, %arg1 : i32
    %c2_i32 = arith.constant 2 : i32
    %2 = arith.muli %1, %c2_i32 : i32
    %3 = arith.addi %2, %arg2 : i32
    %c0_i32 = arith.constant 0 : i32
    %c0_i32_0 = arith.constant 0 : i32
    %c0_i32_1 = arith.constant 0 : i32
    return %3, %c0_i32, %c0_i32_0 : i32, i32, i32
  }
}

</mosaic_0001>

<bundles_post_ra>
// kernel: tpu_custom_call.1
= control target key start
LH: loop header
LB: loop body
LE: loop exit
PB: predicated region body
PF: predicated region fallthrough
CT: control target
= control target key end

     0   :  { %s3534_s21 = smov 0   ;;  %s3536_s22 = smov 0   ;;  %s3955_s0 = inlined_call_operand.vmem [shape: f32[2,4,54], index: 0, kind: input, shape index: {}]   ;;  %s3956_s1 = inlined_call_operand.vmem [shape: bf16[12,2,4], index: 1, kind: input, shape index: {}]   ;;  %s3957_s2 = inlined_call_operand.vmem [shape: bf16[12,39,6,2], index: 2, kind: input, shape index: {}]   ;;  %s3958_s3 = inlined_call_operand.vmem [shape: bf16[12,2,4], index: 3, kind: input, shape index: {}]   ;;  %s3959_s4 = inlined_call_operand.vmem [shape: f32[12,8,1], index: 4, kind: input, shape index: {}]   ;;  %s3960_s5 = inlined_call_operand.vmem [shape: f32[12,8,1], index: 5, kind: input, shape index: {}]   ;;  %s3961_s6 = inlined_call_operand.vmem [shape: f32[24,8,16], index: 6, kind: output, shape index: {}]  }
   0x1   :  { %s3538_s23 = smov 0   ;;  %s3540_s24 = smov 0  }
   0x2   :  { %s3542_s25 = smov 0   ;;  %s3544_s26 = smov 0  }
   0x3   :  { %s3546_s27 = smov 0  }
   0x4 LB: > { %s28_s28 = sadd.s32 1, %s3443_s24  ;;  %s31_s29 = sadd.s32 1, %s3447_s25  ;;  %s3455_s27 = sphi %s3546_s27, %s16_s27   ;;  %s3451_s26 = sphi %s3544_s26, %s3967_s26   ;;  %s3447_s25 = sphi %s3542_s25, %s3966_s25   ;;  %s3443_s24 = sphi %s3540_s24, %s3965_s24   ;;  %s3439_s23 = sphi %s3538_s23, %s3964_s23   ;;  %s3435_s22 = sphi %s3536_s22, %s3963_s22   ;;  %s3431_s21 = sphi %s3534_s21, %s3962_s21  }
   0x5   : > { %p29_p0 = scmp.ge.s32.totalorder %s28_s28, 2  ;;  %p2729_p1 = scmp.ge.s32.totalorder %s3455_s27, 1 }
   0x6   : > { %p322_p2 = scmp.lt.s32.totalorder %s3455_s27, 25  ;;  %s35_s30 = sadd.s32 1, %s3451_s26 }
   0x7   : > { %s3969_s28 = smov (%p29_p0, %s28_s28), 0  ;;  %s3971_s29 = smov (!%p29_p0, %s31_s29), %s3447_s25 }
   0x8   : > { %p323_p3 = pnand %p2729_p1, %p322_p2  ;;  %p33_p4 = scmp.ge.s32.totalorder %s3971_s29, 4 }
   0x9   : > { %p383_p6 = scmp.lt.s32.totalorder (!%p323_p3), %s3431_s21, 1  ;;  %s2731_s7 = sshll.u32 (!%p323_p3), %s3439_s23, 2  ;;  %v3457_v0 = vmov (!%p323_p3), 0.0   ;;  %vm3458_vm0 = vmmov (!%p323_p3), 0   ;;  %vm446_vm1 = vcmask (!%p323_p3), 1041408   ;;  %vm442_vm2 = vcmask (!%p323_p3), 31744  }
   0xa   : > { %s3973_s29 = smov (%p33_p4, %s3971_s29), 0  ;;  %s3975_s30 = smov (!%p33_p4, %s35_s30), %s3451_s26 }
   0xb   : > { %p37_p5 = scmp.ge.s32.totalorder %s3975_s30, 3  ;;  %326 = sbr.rel (%p323_p3) target bundleno = 854 (0x356), region = 44  ;;  %2905 = vmatprep.subr.bf16.mxu0 (!%p323_p3), %v3457_v0  ;;  %2907 = vmatprep.mubr.msk.bf16.mxu0 (!%p323_p3), %vm3458_vm0, %v3457_v0  ;;  %vm501_vm3 = vcmask (!%p323_p3), 1040384   ;;  %vm497_vm4 = vcmask (!%p323_p3), 15360   ;;  %v2478_v34 = vlaneseq (!%p323_p3)  ;;  %vm2563_vm7 = vcmask (!%p323_p3), 128000  }
   0xc   : > { %s3582_s8 = sadd.s32 (!%p323_p3), %s3435_s22, %s2731_s7  ;;  %3019 = vmatprep.subr.bf16.mxu1 (!%p323_p3), %v3457_v0  ;;  %3021 = vmatprep.mubr.msk.bf16.mxu1 (!%p323_p3), %vm3458_vm0, %v3457_v0  ;;  %s3459_s18 = smov (!%p323_p3), 108   ;;  %vm2572_vm8 = vcmask (!%p323_p3), 123904  }
   0xd   : > { %s3977_s30 = smov (%p37_p5, %s3975_s30), 0  ;;  %p389_p7 = scmp.lt.s32.totalorder (!%p323_p3), %s3582_s8, 11  ;;  %v2479_v38 = vand.u32 (!%p323_p3), 127, %v2478_v34 }
   0xe   : > { %s3460_s19 = smov (!%p323_p3), 110   ;;  %s3461_s20 = smov (!%p323_p3), 127  }
   0xf   : > { %s3462_s22 = smov (!%p323_p3), 109   ;;  %s3463_s23 = smov (!%p323_p3), 106   ;;  %vm2480_vm5 = vcmp.gt.s32.totalorder (!%p323_p3), %v2479_v38, 0  ;;  %vm2486_vm6 = vcmp.lt.s32.totalorder (!%p323_p3), %v2479_v38, 15 }
  0x10   : > { %s3464_s7 = smov (!%p323_p3), 107   ;;  %s3467_s11 = smov (!%p323_p3), 104  }
  0x11   : > { %s3468_s12 = smov (!%p323_p3), 125   ;;  %s3470_s15 = smov (!%p323_p3), 124  }
  0x12   : > { %s384_s9 = scalar_select %p383_p6, %s3431_s21, 1 }
  0x13   : > { %s3595_s14 = scalar_select %p389_p7, %s3582_s8, 11 }
  0x14   : > { %s2730_s10 = sshll.u32 %s384_s9, 2  ;;  %s3465_s9 = smov 105  }
  0x15   : > { %s386_s13 = scalar_lea.vmem %s3955_s0, %s2730_s10  ;;  %s391_s17 = scalar_lea.vmem %s3956_s1, %s3595_s14 }
  0x16   : > { %v3592_v1 = vld [vmem:[%s386_s13] sm:$0xf]  ;;  %s3466_s10 = smov 126   ;;  %s3469_s13 = smov 103  }
  0x17   : > { %v440_v2 = vpack.c.bf16 %v3592_v1, %v3592_v1  ;;  %v441_v4 = vld [vmem:[%s391_s17] sm:$0x1]  ;;  %s3471_s16 = smov 102   ;;  %s3472_s17 = smov 123  }
  0x19   : > { %v448_v3 = vsel %vm446_vm1, %v440_v2, 0 }
  0x1a   : > { %2906 = vmatpush3.bf16.msra.mxu0 %v448_v3 }
  0x1b   : > { %2911 = vmatprep.subr.bf16.mxu0 %v3457_v0 }
  0x1d   : > { %2908 = vmatmul.mubr.msk.bf16.vlgmr.msra.gmra.mrb[0].mxu0 %vm442_vm2, %v441_v4 }
  0x1e   : > { %2913 = vmatprep.mubr.msk.bf16.mxu0 %vm3458_vm0, %v3457_v0 }
  0xf0   : > { %v484_v5 = vpop.f32.mrb[0].mxu0 }
  0xf1   : > { %v3608_v6 = vpack.c.bf16 %v484_v5, %v484_v5  ;;  %v2909_v7 = vpop.f32.mrb[1].mxu0 }
  0xf2   : > { %v487_v8 = vpop.f32.mrb[2].mxu0 }
  0xf3   : > { %1511 = vrot.lane.b32.xlu1 %v3608_v6, %s3459_s18  ;;  %1409 = vrot.lane.b32.xlu0 %v3608_v6, %s3460_s19  ;;  %v2910_v9 = vpop.f32.mrb[3].mxu0  ;;  %v549_v21 = vsel %vm501_vm3, %v3608_v6, 0 }
  0xf7   : > { %495 = vrot.lane.b32.xlu1 %v3608_v6, %s3461_s20  ;;  %1460 = vrot.lane.b32.xlu0 %v3608_v6, %s3462_s22  ;;  %s3473_s20 = smov 101  }
  0xfb   : > { %1613 = vrot.lane.b32.xlu1 %v3608_v6, %s3463_s23  ;;  %1562 = vrot.lane.b32.xlu0 %v3608_v6, %s3464_s7  ;;  %s3474_s23 = smov 122   ;;  %s3475_s7 = smov 121  }
  0xff   : > { %1664 = vrot.lane.b32.xlu1 %v3608_v6, %s3465_s9  ;;  %593 = vrot.lane.b32.xlu0 %v3608_v6, %s3466_s10  ;;  %s3476_s9 = smov 100   ;;  %s3477_s10 = smov 99  }
 0x103   : > { %1715 = vrot.lane.b32.xlu1 %v3608_v6, %s3467_s11  ;;  %644 = vrot.lane.b32.xlu0 %v3608_v6, %s3468_s12  ;;  %s3478_s11 = smov 120   ;;  %s3479_s12 = smov 98  }
 0x107   : > { %1766 = vrot.lane.b32.xlu1 %v3608_v6, %s3469_s13  ;;  %695 = vrot.lane.b32.xlu0 %v3608_v6, %s3470_s15  ;;  %s3480_s13 = smov 119   ;;  %s3482_s15 = smov 118  }
 0x10b   : > { %1817 = vrot.lane.b32.xlu1 %v3608_v6, %s3471_s16  ;;  %746 = vrot.lane.b32.xlu0 %v3608_v6, %s3472_s17  ;;  %s3483_s16 = smov 96   ;;  %s3485_s17 = smov 95  }
 0x10f   : > { %1868 = vrot.lane.b32.xlu1 %v3608_v6, %s3473_s20  ;;  %797 = vrot.lane.b32.xlu0 %v3608_v6, %s3474_s23  ;;  %s3486_s20 = smov 116   ;;  %s3487_s23 = smov 115  }
 0x113   : > { %2482 = vrot.lane.b32.xlu1 %v3592_v1, %s3460_s19  ;;  %848 = vrot.lane.b32.xlu0 %v3608_v6, %s3475_s7  ;;  %s3481_s19 = smov 97   ;;  %s3488_s7 = smov 114  }
 0x117   : > { %1919 = vrot.lane.b32.xlu1 %v3608_v6, %s3476_s9  ;;  %2487 = vrot.lane.b32.xlu0 %v3592_v1, %s3459_s18  ;;  %s3484_s18 = smov 117   ;;  %s3489_s9 = smov 113  }
 0x11b   : > { %1970 = vrot.lane.b32.xlu1 %v3608_v6, %s3477_s10  ;;  %899 = vrot.lane.b32.xlu0 %v3608_v6, %s3478_s11  ;;  %s3490_s10 = smov 112   ;;  %s3491_s11 = smov 111  }
 0x11f   : > { %2021 = vrot.lane.b32.xlu1 %v3608_v6, %s3479_s12  ;;  %950 = vrot.lane.b32.xlu0 %v3608_v6, %s3480_s13  ;;  %s3300_s12 = smul.u32 156, %s3595_s14 }
 0x123   : > { %2072 = vrot.lane.b32.xlu1 %v3608_v6, %s3481_s19  ;;  %1001 = vrot.lane.b32.xlu0 %v3608_v6, %s3482_s15  ;;  %s3654_s15 = scalar_lea.vmem %s3957_s2, %s3300_s12 }
 0x124   : > { %v2778_v13 = vld [vmem:[%s3654_s15 + $0x48] sm:$0x7]  ;;  %v2743_v18 = vld [vmem:[%s3654_s15 + $0x4] sm:$0x7]  ;;  %v2780_v24 = vld [vmem:[%s3654_s15 + $0x4c] sm:$0x7] }
 0x125   : > { %v491_v28 = vld [vmem:[%s3654_s15] sm:$0x7]  ;;  %v2782_v35 = vld [vmem:[%s3654_s15 + $0x50] sm:$0x7]  ;;  %v2746_v40 = vld [vmem:[%s3654_s15 + $0x8] sm:$0x7] }
 0x126   : > { %v2784_v48 = vld [vmem:[%s3654_s15 + $0x54] sm:$0x7]  ;;  %v2748_v50 = vld [vmem:[%s3654_s15 + $0xc] sm:$0x7]  ;;  %v2786_v52 = vld [vmem:[%s3654_s15 + $0x58] sm:$0x7] }
 0x127   : > { %2123 = vrot.lane.b32.xlu1 %v3608_v6, %s3483_s16  ;;  %1052 = vrot.lane.b32.xlu0 %v3608_v6, %s3484_s18  ;;  %s3492_s16 = smov 19   ;;  %s3493_s18 = smov 94   ;;  %v2750_v54 = vld [vmem:[%s3654_s15 + $0x10] sm:$0x7]  ;;  %v2788_v56 = vld [vmem:[%s3654_s15 + $0x5c] sm:$0x7] }
 0x128   : > { %v2752_v58 = vld [vmem:[%s3654_s15 + $0x14] sm:$0x7]  ;;  %v2790_v60 = vld [vmem:[%s3654_s15 + $0x60] sm:$0x7]  ;;  %v2754_v62 = vld [vmem:[%s3654_s15 + $0x18] sm:$0x7] }
 0x129   : > { %v2792_v2 = vld [vmem:[%s3654_s15 + $0x64] sm:$0x7]  ;;  %v2756_v5 = vld [vmem:[%s3654_s15 + $0x1c] sm:$0x7]  ;;  %v2794_v7 = vld [vmem:[%s3654_s15 + $0x68] sm:$0x7] }
 0x12b   : > { %2174 = vrot.lane.b32.xlu1 %v3608_v6, %s3485_s17  ;;  %1103 = vrot.lane.b32.xlu0 %v3608_v6, %s3486_s20  ;;  %s3494_s17 = smov 93   ;;  %s3495_s20 = smov 92  }
 0x12f   : > { %1154 = vrot.lane.b32.xlu1 %v3608_v6, %s3487_s23  ;;  %s3496_s23 = smov 91  }
 0x133   : > { %1205 = vrot.lane.b32.xlu1 %v3608_v6, %s3488_s7  ;;  %s3497_s7 = smov 90  }
 0x137   : > { %1256 = vrot.lane.b32.xlu1 %v3608_v6, %s3489_s9  ;;  %s2736_s9 = sshll.u32 %s3595_s14, 3 }
 0x138   : > { %s415_s12 = scalar_lea.vmem %s3959_s4, %s2736_s9 }
 0x139   : > { %v2548_v38 = vld [vmem:[%s415_s12] sm:$0xff] }
 0x13b   : > { %1307 = vrot.lane.b32.xlu1 %v3608_v6, %s3490_s10 }
 0x13f   : > { %1358 = vrot.lane.b32.xlu1 %v3608_v6, %s3491_s11 }
 0x165   : > { %v1512_v10 = vpop.permute.xlu1 %1511  ;;  %v1410_v11 = vpop.permute.xlu0 %1409 }
 0x166   : > { %v1415_v12 = vsel %vm501_vm3, %v1410_v11, 0  ;;  %v1517_v27 = vsel %vm501_vm3, %v1512_v10, 0  ;;  %v2758_v10 = vld [vmem:[%s3654_s15 + $0x20] sm:$0x7] }
 0x167   : > { %3020 = vmatpush3.bf16.msra.mxu1 %v1415_v12 }
 0x168   : > { %3025 = vmatprep.subr.bf16.mxu1 %v3457_v0 }
 0x169   : > { %v496_v14 = vpop.permute.xlu1 %495  ;;  %v1461_v15 = vpop.permute.xlu0 %1460 }
 0x16a   : > { %v503_v16 = vsel %vm501_vm3, %v496_v14, 0  ;;  %v1466_v17 = vsel %vm501_vm3, %v1461_v15, 0  ;;  %3022 = vmatmul.mubr.msk.bf16.vlgmr.msra.gmra.mrb[0].mxu1 %vm497_vm4, %v2778_v13  ;;  %v2796_v13 = vld [vmem:[%s3654_s15 + $0x6c] sm:$0x7] }
 0x16b   : > { %2912 = vmatpush3.bf16.msra.mxu0 %v503_v16  ;;  %3026 = vmatpush3.bf16.msra.mxu1 %v1466_v17  ;;  %v2760_v16 = vld [vmem:[%s3654_s15 + $0x24] sm:$0x7] }
 0x16c   : > { %2917 = vmatprep.subr.bf16.mxu0 %v3457_v0  ;;  %3027 = vmatprep.mubr.msk.bf16.mxu1 %vm3458_vm0, %v3457_v0 }
 0x16d   : > { %v1614_v19 = vpop.permute.xlu1 %1613  ;;  %v1563_v20 = vpop.permute.xlu0 %1562  ;;  %3031 = vmatprep.subr.bf16.mxu1 %v3457_v0 }
 0x16e   : > { %2914 = vmatmul.mubr.msk.bf16.vlgmr.msra.gmra.mrb[4].mxu0 %vm497_vm4, %v2743_v18  ;;  %v1568_v39 = vsel %vm501_vm3, %v1563_v20, 0  ;;  %v1619_v49 = vsel %vm501_vm3, %v1614_v19, 0  ;;  %v2798_v19 = vld [vmem:[%s3654_s15 + $0x70] sm:$0x7] }
 0x16f   : > { %2918 = vmatpush3.bf16.msra.mxu0 %v549_v21  ;;  %2919 = vmatprep.mubr.msk.bf16.mxu0 %vm3458_vm0, %v3457_v0 }
 0x170   : > { %2923 = vmatprep.subr.bf16.mxu0 %v3457_v0 }
 0x171   : > { %v3673_v22 = vpop.permute.xlu1 %1664  ;;  %v594_v23 = vpop.permute.xlu0 %593 }
 0x172   : > { %v599_v31 = vsel %vm501_vm3, %v594_v23, 0  ;;  %v1670_v53 = vsel %vm501_vm3, %v3673_v22, 0  ;;  %v2762_v23 = vld [vmem:[%s3654_s15 + $0x28] sm:$0x7] }
 0x175   : > { %v3676_v25 = vpop.permute.xlu1 %1715  ;;  %v645_v26 = vpop.permute.xlu0 %644 }
 0x176   : > { %3028 = vmatmul.mubr.msk.bf16.vlgmr.msra.gmra.mrb[0].mxu1 %vm497_vm4, %v2780_v24  ;;  %v650_v42 = vsel %vm501_vm3, %v645_v26, 0  ;;  %v1721_v57 = vsel %vm501_vm3, %v3676_v25, 0  ;;  %v2800_v26 = vld [vmem:[%s3654_s15 + $0x74] sm:$0x7] }
 0x177   : > { %3032 = vmatpush3.bf16.msra.mxu1 %v1517_v27  ;;  %3033 = vmatprep.mubr.msk.bf16.mxu1 %vm3458_vm0, %v3457_v0 }
 0x178   : > { %3037 = vmatprep.subr.bf16.mxu1 %v3457_v0 }
 0x179   : > { %v3684_v29 = vpop.permute.xlu1 %1766  ;;  %v696_v30 = vpop.permute.xlu0 %695 }
 0x17a   : > { %2920 = vmatmul.mubr.msk.bf16.vlgmr.msra.gmra.mrb[4].mxu0 %vm497_vm4, %v491_v28  ;;  %v701_v51 = vsel %vm501_vm3, %v696_v30, 0  ;;  %v1772_v61 = vsel %vm501_vm3, %v3684_v29, 0  ;;  %v2764_v30 = vld [vmem:[%s3654_s15 + $0x2c] sm:$0x7] }
 0x17b   : > { %2924 = vmatpush3.bf16.msra.mxu0 %v599_v31  ;;  %2925 = vmatprep.mubr.msk.bf16.mxu0 %vm3458_vm0, %v3457_v0 }
 0x17c   : > { %2929 = vmatprep.subr.bf16.mxu0 %v3457_v0 }
 0x17d   : > { %v3691_v32 = vpop.permute.xlu1 %1817  ;;  %v747_v33 = vpop.permute.xlu0 %746 }
 0x17e   : > { %v752_v55 = vsel %vm501_vm3, %v747_v33, 0  ;;  %v1823_v3 = vsel %vm501_vm3, %v3691_v32, 0  ;;  %v2802_v33 = vld [vmem:[%s3654_s15 + $0x78] sm:$0x7] }
 0x181   : > { %v3694_v36 = vpop.permute.xlu1 %1868  ;;  %v3696_v37 = vpop.permute.xlu0 %797 }
 0x182   : > { %3034 = vmatmul.mubr.msk.bf16.vlgmr.msra.gmra.mrb[0].mxu1 %vm497_vm4, %v2782_v35  ;;  %v803_v59 = vsel %vm501_vm3, %v3696_v37, 0  ;;  %v1874_v8 = vsel %vm501_vm3, %v3694_v36, 0  ;;  %v2766_v36 = vld [vmem:[%s3654_s15 + $0x30] sm:$0x7]  ;;  %v3498_v37 = vmov 0  }
 0x183   : > { %3038 = vmatpush3.bf16.msra.mxu1 %v1568_v39  ;;  %3039 = vmatprep.mubr.msk.bf16.mxu1 %vm3458_vm0, %v3457_v0 }
 0x184   : > { %3043 = vmatprep.subr.bf16.mxu1 %v3457_v0  ;;  %3399 = vset.pattern.permute.xlu0 %v3498_v37 }
 0x185   : > { %v3704_v41 = vpop.permute.xlu0 %848  ;;  %v2483_v43 = vpop.permute.xlu1 %2482  ;;  %3400 = vset.pattern.permute.xlu1 %v3498_v37 }
 0x186   : > { %2926 = vmatmul.mubr.msk.bf16.vlgmr.msra.gmra.mrb[4].mxu0 %vm497_vm4, %v2746_v40  ;;  %v2485_v44 = vsel %vm2480_vm5, %v2483_v43, -inf  ;;  %v854_v63 = vsel %vm501_vm3, %v3704_v41, 0  ;;  %v2804_v43 = vld [vmem:[%s3654_s15 + $0x7c] sm:$0x7] }
 0x187   : > { %2930 = vmatpush3.bf16.msra.mxu0 %v650_v42  ;;  %2931 = vmatprep.mubr.msk.bf16.mxu0 %vm3458_vm0, %v3457_v0 }
 0x188   : > { %2935 = vmatprep.subr.bf16.mxu0 %v3457_v0 }
 0x189   : > { %v2488_v45 = vpop.permute.xlu0 %2487  ;;  %v1920_v12 = vpop.permute.xlu1 %1919 }
 0x18a   : > { %v2490_v46 = vsel %vm2486_vm6, %v2488_v45, -inf  ;;  %v1925_v14 = vsel %vm501_vm3, %v1920_v12, 0 }
 0x18b   : > { %v2491_v47 = vmax.f32 %v2485_v44, %v2490_v46 }
 0x18d   : > { %2493 = vrot.lane.b32.xlu0 %v2491_v47, %s3492_s16  ;;  %v900_v4 = vpop.permute.xlu0 %899  ;;  %v1971_v18 = vpop.permute.xlu1 %1970  ;;  %s423_s16 = scalar_lea.vmem %s3960_s5, %s2736_s9 }
 0x18e   : > { %3040 = vmatmul.mubr.msk.bf16.vlgmr.msra.gmra.mrb[0].mxu1 %vm497_vm4, %v2784_v48  ;;  %v1976_v20 = vsel %vm501_vm3, %v1971_v18, 0  ;;  %v2549_v44 = vld [vmem:[%s423_s16] sm:$0xff] }
 0x18f   : > { %3044 = vmatpush3.bf16.msra.mxu1 %v1619_v49  ;;  %3045 = vmatprep.mubr.msk.bf16.mxu1 %vm3458_vm0, %v3457_v0  ;;  %v2806_v48 = vld [vmem:[%s3654_s15 + $0x80] sm:$0x7] }
 0x190   : > { %3049 = vmatprep.subr.bf16.mxu1 %v3457_v0 }
 0x191   : > { %2225 = vrot.lane.b32.xlu0 %v3608_v6, %s3493_s18  ;;  %v951_v9 = vpop.permute.xlu0 %950  ;;  %v2022_v21 = vpop.permute.xlu1 %2021 }
 0x192   : > { %2932 = vmatmul.mubr.msk.bf16.vlgmr.msra.gmra.mrb[4].mxu0 %vm497_vm4, %v2748_v50  ;;  %v956_v11 = vsel %vm501_vm3, %v951_v9, 0  ;;  %v2027_v27 = vsel %vm501_vm3, %v2022_v21, 0 }
 0x193   : > { %2936 = vmatpush3.bf16.msra.mxu0 %v701_v51  ;;  %2937 = vmatprep.mubr.msk.bf16.mxu0 %vm3458_vm0, %v3457_v0  ;;  %v2770_v51 = vld [vmem:[%s3654_s15 + $0x38] sm:$0x7] }
 0x194   : > { %2941 = vmatprep.subr.bf16.mxu0 %v3457_v0 }
 0x195   : > { %2276 = vrot.lane.b32.xlu0 %v3608_v6, %s3494_s17  ;;  %v1002_v15 = vpop.permute.xlu0 %1001  ;;  %v2073_v25 = vpop.permute.xlu1 %2072  ;;  %s407_s17 = scalar_lea.vmem %s3958_s3, %s3595_s14 }
 0x196   : > { %v1007_v17 = vsel %vm501_vm3, %v1002_v15, 0  ;;  %v2078_v34 = vsel %vm501_vm3, %v2073_v25, 0 }
 0x199   : > { %2327 = vrot.lane.b32.xlu0 %v3608_v6, %s3495_s20  ;;  %v1053_v22 = vpop.permute.xlu0 %1052  ;;  %v2124_v28 = vpop.permute.xlu1 %2123  ;;  %s2740_s20 = sshll.u32 %s3582_s8, 1 }
 0x19a   : > { %3046 = vmatmul.mubr.msk.bf16.vlgmr.msra.gmra.mrb[0].mxu1 %vm497_vm4, %v2786_v52  ;;  %v1058_v24 = vsel %vm501_vm3, %v1053_v22, 0  ;;  %v2129_v45 = vsel %vm501_vm3, %v2124_v28, 0 }
 0x19b   : > { %3050 = vmatpush3.bf16.msra.mxu1 %v1670_v53  ;;  %3051 = vmatprep.mubr.msk.bf16.mxu1 %vm3458_vm0, %v3457_v0 }
 0x19c   : > { %3055 = vmatprep.subr.bf16.mxu1 %v3457_v0 }
 0x19d   : > { %2378 = vrot.lane.b32.xlu0 %v3608_v6, %s3496_s23  ;;  %v1104_v29 = vpop.permute.xlu0 %1103  ;;  %v2175_v32 = vpop.permute.xlu1 %2174  ;;  %s429_s23 = sadd.s32 %s3431_s21, %s2740_s20 }
 0x19e   : > { %2938 = vmatmul.mubr.msk.bf16.vlgmr.msra.gmra.mrb[4].mxu0 %vm497_vm4, %v2750_v54  ;;  %v1109_v31 = vsel %vm501_vm3, %v1104_v29, 0  ;;  %v2180_v49 = vsel %vm501_vm3, %v2175_v32, 0  ;;  %v2808_v54 = vld [vmem:[%s3654_s15 + $0x84] sm:$0x7]  ;;  %p430_p8 = scmp.lt.s32.totalorder %s429_s23, 23 }
 0x19f   : > { %2942 = vmatpush3.bf16.msra.mxu0 %v752_v55  ;;  %2943 = vmatprep.mubr.msk.bf16.mxu0 %vm3458_vm0, %v3457_v0 }
 0x1a0   : > { %2947 = vmatprep.subr.bf16.mxu0 %v3457_v0  ;;  %s3979_s23 = smov (!%p430_p8, %s429_s23), 23 }
 0x1a1   : > { %2429 = vrot.lane.b32.xlu0 %v3608_v6, %s3497_s7  ;;  %v905_v6 = vsel %vm501_vm3, %v900_v4, 0  ;;  %v1155_v35 = vpop.permute.xlu1 %1154  ;;  %v2812_v4 = vld [vmem:[%s3654_s15 + $0x8c] sm:$0x7]  ;;  %s2741_s14 = sshll.u32 %s3979_s23, 3 }
 0x1a2   : > { %v1160_v39 = vsel %vm501_vm3, %v1155_v35, 0  ;;  %s433_s9 = scalar_lea.vmem %s3961_s6, %s2741_s14 }
 0x1a5   : > { %2552 = vperm.xlu0 %3399, %v2548_v38   ;;  %v1206_v46 = vpop.permute.xlu1 %1205 }
 0x1a6   : > { %3052 = vmatmul.mubr.msk.bf16.vlgmr.msra.gmra.mrb[0].mxu1 %vm497_vm4, %v2788_v56  ;;  %v1211_v47 = vsel %vm501_vm3, %v1206_v46, 0 }
 0x1a7   : > { %3056 = vmatpush3.bf16.msra.mxu1 %v1721_v57  ;;  %3057 = vmatprep.mubr.msk.bf16.mxu1 %vm3458_vm0, %v3457_v0  ;;  %v2772_v57 = vld [vmem:[%s3654_s15 + $0x3c] sm:$0x7] }
 0x1a8   : > { %3061 = vmatprep.subr.bf16.mxu1 %v3457_v0 }
 0x1a9   : > { %v1257_v50 = vpop.permute.xlu1 %1256 }
 0x1aa   : > { %2944 = vmatmul.mubr.msk.bf16.vlgmr.msra.gmra.mrb[4].mxu0 %vm497_vm4, %v2752_v58  ;;  %v1262_v52 = vsel %vm501_vm3, %v1257_v50, 0 }
 0x1ab   : > { %2948 = vmatpush3.bf16.msra.mxu0 %v803_v59  ;;  %2949 = vmatprep.mubr.msk.bf16.mxu0 %vm3458_vm0, %v3457_v0 }
 0x1ac   : > { %2953 = vmatprep.subr.bf16.mxu0 %v3457_v0 }
 0x1ad   : > { %v1308_v56 = vpop.permute.xlu1 %1307 }
 0x1ae   : > { %v1313_v58 = vsel %vm501_vm3, %v1308_v56, 0 }
 0x1b2   : > { %3058 = vmatmul.mubr.msk.bf16.vlgmr.msra.gmra.mrb[0].mxu1 %vm497_vm4, %v2790_v60  ;;  %v2810_v60 = vld [vmem:[%s3654_s15 + $0x88] sm:$0x7] }
 0x1b3   : > { %3062 = vmatpush3.bf16.msra.mxu1 %v1772_v61  ;;  %3063 = vmatprep.mubr.msk.bf16.mxu1 %vm3458_vm0, %v3457_v0 }
 0x1b4   : > { %3067 = vmatprep.subr.bf16.mxu1 %v3457_v0 }
 0x1b6   : > { %2950 = vmatmul.mubr.msk.bf16.vlgmr.msra.gmra.mrb[4].mxu0 %vm497_vm4, %v2754_v62  ;;  %v1359_v62 = vpop.permute.xlu1 %1358 }
 0x1b7   : > { %2954 = vmatpush3.bf16.msra.mxu0 %v854_v63  ;;  %2955 = vmatprep.mubr.msk.bf16.mxu0 %vm3458_vm0, %v3457_v0  ;;  %v2774_v63 = vld [vmem:[%s3654_s15 + $0x40] sm:$0x7] }
 0x1b8   : > { %2959 = vmatprep.subr.bf16.mxu0 %v3457_v0 }
 0x1be   : > { %3064 = vmatmul.mubr.msk.bf16.vlgmr.msra.gmra.mrb[0].mxu1 %vm497_vm4, %v2792_v2  ;;  %v1364_v2 = vsel %vm501_vm3, %v1359_v62, 0 }
 0x1bf   : > { %3068 = vmatpush3.bf16.msra.mxu1 %v1823_v3  ;;  %3069 = vmatprep.mubr.msk.bf16.mxu1 %vm3458_vm0, %v3457_v0 }
 0x1c0   : > { %3073 = vmatprep.subr.bf16.mxu1 %v3457_v0 }
 0x1c2   : > { %2956 = vmatmul.mubr.msk.bf16.vlgmr.msra.gmra.mrb[4].mxu0 %vm497_vm4, %v2756_v5 }
 0x1c3   : > { %2960 = vmatpush3.bf16.msra.mxu0 %v905_v6  ;;  %2961 = vmatprep.mubr.msk.bf16.mxu0 %vm3458_vm0, %v3457_v0  ;;  %v2776_v6 = vld [vmem:[%s3654_s15 + $0x44] sm:$0x7] }
 0x1c4   : > { %2965 = vmatprep.subr.bf16.mxu0 %v3457_v0 }
 0x1ca   : > { %3070 = vmatmul.mubr.msk.bf16.vlgmr.msra.gmra.mrb[0].mxu1 %vm497_vm4, %v2794_v7 }
 0x1cb   : > { %3074 = vmatpush3.bf16.msra.mxu1 %v1874_v8  ;;  %3075 = vmatprep.mubr.msk.bf16.mxu1 %vm3458_vm0, %v3457_v0  ;;  %v2814_v8 = vld [vmem:[%s3654_s15 + $0x90] sm:$0x7] }
 0x1cc   : > { %3079 = vmatprep.subr.bf16.mxu1 %v3457_v0 }
 0x1ce   : > { %2962 = vmatmul.mubr.msk.bf16.vlgmr.msra.gmra.mrb[4].mxu0 %vm497_vm4, %v2758_v10 }
 0x1cf   : > { %2966 = vmatpush3.bf16.msra.mxu0 %v956_v11  ;;  %2967 = vmatprep.mubr.msk.bf16.mxu0 %vm3458_vm0, %v3457_v0  ;;  %v2816_v11 = vld [vmem:[%s3654_s15 + $0x94] sm:$0x7] }
 0x1d0   : > { %2971 = vmatprep.subr.bf16.mxu0 %v3457_v0 }
 0x1d6   : > { %3076 = vmatmul.mubr.msk.bf16.vlgmr.msra.gmra.mrb[0].mxu1 %vm497_vm4, %v2796_v13  ;;  %v2818_v13 = vld [vmem:[%s3654_s15 + $0x98] sm:$0x7] }
 0x1d7   : > { %3080 = vmatpush3.bf16.msra.mxu1 %v1925_v14  ;;  %3081 = vmatprep.mubr.msk.bf16.mxu1 %vm3458_vm0, %v3457_v0 }
 0x1d8   : > { %3085 = vmatprep.subr.bf16.mxu1 %v3457_v0 }
 0x1da   : > { %2968 = vmatmul.mubr.msk.bf16.vlgmr.msra.gmra.mrb[4].mxu0 %vm497_vm4, %v2760_v16  ;;  %v2497_v16 = vld [vmem:[%s407_s17] sm:$0x1] }
 0x1db   : > { %2972 = vmatpush3.bf16.msra.mxu0 %v1007_v17  ;;  %2973 = vmatprep.mubr.msk.bf16.mxu0 %vm3458_vm0, %v3457_v0 }
 0x1dc   : > { %2977 = vmatprep.subr.bf16.mxu0 %v3457_v0 }
 0x1e2   : > { %3082 = vmatmul.mubr.msk.bf16.vlgmr.msra.gmra.mrb[0].mxu1 %vm497_vm4, %v2798_v19 }
 0x1e3   : > { %3086 = vmatpush3.bf16.msra.mxu1 %v1976_v20  ;;  %3087 = vmatprep.mubr.msk.bf16.mxu1 %vm3458_vm0, %v3457_v0 }
 0x1e4   : > { %3091 = vmatprep.subr.bf16.mxu1 %v3457_v0 }
 0x1e6   : > { %2974 = vmatmul.mubr.msk.bf16.vlgmr.msra.gmra.mrb[4].mxu0 %vm497_vm4, %v2762_v23 }
 0x1e7   : > { %2978 = vmatpush3.bf16.msra.mxu0 %v1058_v24  ;;  %2979 = vmatprep.mubr.msk.bf16.mxu0 %vm3458_vm0, %v3457_v0 }
 0x1e8   : > { %2983 = vmatprep.subr.bf16.mxu0 %v3457_v0 }
 0x1ee   : > { %3088 = vmatmul.mubr.msk.bf16.vlgmr.msra.gmra.mrb[0].mxu1 %vm497_vm4, %v2800_v26 }
 0x1ef   : > { %3092 = vmatpush3.bf16.msra.mxu1 %v2027_v27  ;;  %3093 = vmatprep.mubr.msk.bf16.mxu1 %vm3458_vm0, %v3457_v0 }
 0x1f0   : > { %3097 = vmatprep.subr.bf16.mxu1 %v3457_v0 }
 0x1f2   : > { %2980 = vmatmul.mubr.msk.bf16.vlgmr.msra.gmra.mrb[4].mxu0 %vm497_vm4, %v2764_v30 }
 0x1f3   : > { %2984 = vmatpush3.bf16.msra.mxu0 %v1109_v31  ;;  %2985 = vmatprep.mubr.msk.bf16.mxu0 %vm3458_vm0, %v3457_v0 }
 0x1f4   : > { %2989 = vmatprep.subr.bf16.mxu0 %v3457_v0 }
 0x1fa   : > { %3094 = vmatmul.mubr.msk.bf16.vlgmr.msra.gmra.mrb[0].mxu1 %vm497_vm4, %v2802_v33 }
 0x1fb   : > { %3098 = vmatpush3.bf16.msra.mxu1 %v2078_v34  ;;  %3099 = vmatprep.mubr.msk.bf16.mxu1 %vm3458_vm0, %v3457_v0 }
 0x1fc   : > { %3103 = vmatprep.subr.bf16.mxu1 %v3457_v0 }
 0x1fe   : > { %2986 = vmatmul.mubr.msk.bf16.vlgmr.msra.gmra.mrb[4].mxu0 %vm497_vm4, %v2766_v36 }
 0x1ff   : > { %2990 = vmatpush3.bf16.msra.mxu0 %v1160_v39  ;;  %v2494_v40 = vpop.permute.xlu0 %2493  ;;  %2991 = vmatprep.mubr.msk.bf16.mxu0 %vm3458_vm0, %v3457_v0 }
 0x200   : > { %v2496_v41 = vmax.f32 %v3592_v1, %v2494_v40  ;;  %2995 = vmatprep.subr.bf16.mxu0 %v3457_v0  ;;  %v2768_v1 = vld [vmem:[%s3654_s15 + $0x34] sm:$0x7] }
 0x202   : > { %v2498_v42 = vpack.c.bf16 %v2496_v41, %v2496_v41 }
 0x203   : > { %v2226_v53 = vpop.permute.xlu0 %2225 }
 0x204   : > { %2500 = vrot.lane.b32.xlu1 %v2498_v42, %s3462_s22  ;;  %v2231_v55 = vsel %vm501_vm3, %v2226_v53, 0 }
 0x206   : > { %3100 = vmatmul.mubr.msk.bf16.vlgmr.msra.gmra.mrb[0].mxu1 %vm497_vm4, %v2804_v43 }
 0x207   : > { %3104 = vmatpush3.bf16.msra.mxu1 %v2129_v45  ;;  %3105 = vmatprep.mubr.msk.bf16.mxu1 %vm3458_vm0, %v3457_v0  ;;  %v2277_v59 = vpop.permute.xlu0 %2276 }
 0x208   : > { %3109 = vmatprep.subr.bf16.mxu1 %v3457_v0  ;;  %2558 = vperm.xlu1 %3400, %v2549_v44   ;;  %v2282_v61 = vsel %vm501_vm3, %v2277_v59, 0 }
 0x20a   : > { %2992 = vmatmul.mubr.msk.bf16.vlgmr.msra.gmra.mrb[4].mxu0 %vm497_vm4, %v2768_v1 }
 0x20b   : > { %2996 = vmatpush3.bf16.msra.mxu0 %v1211_v47  ;;  %2997 = vmatprep.mubr.msk.bf16.mxu0 %vm3458_vm0, %v3457_v0  ;;  %v2328_v3 = vpop.permute.xlu0 %2327 }
 0x20c   : > { %3001 = vmatprep.subr.bf16.mxu0 %v3457_v0  ;;  %v2333_v5 = vsel %vm501_vm3, %v2328_v3, 0 }
 0x20f   : > { %v2379_v7 = vpop.permute.xlu0 %2378 }
 0x210   : > { %v2384_v9 = vsel %vm501_vm3, %v2379_v7, 0 }
 0x212   : > { %3106 = vmatmul.mubr.msk.bf16.vlgmr.msra.gmra.mrb[0].mxu1 %vm497_vm4, %v2806_v48 }
 0x213   : > { %3110 = vmatpush3.bf16.msra.mxu1 %v2180_v49  ;;  %3111 = vmatprep.mubr.msk.bf16.mxu1 %vm3458_vm0, %v3457_v0  ;;  %v2430_v10 = vpop.permute.xlu0 %2429 }
 0x214   : > { %3115 = vmatprep.subr.bf16.mxu1 %v3457_v0  ;;  %v2435_v12 = vsel %vm501_vm3, %v2430_v10, 0 }
 0x216   : > { %2998 = vmatmul.mubr.msk.bf16.vlgmr.msra.gmra.mrb[4].mxu0 %vm497_vm4, %v2770_v51 }
 0x217   : > { %3002 = vmatpush3.bf16.msra.mxu0 %v1262_v52  ;;  %3003 = vmatprep.mubr.msk.bf16.mxu0 %vm3458_vm0, %v3457_v0 }
 0x218   : > { %3007 = vmatprep.subr.bf16.mxu0 %v3457_v0 }
 0x21e   : > { %3112 = vmatmul.mubr.msk.bf16.vlgmr.msra.gmra.mrb[0].mxu1 %vm497_vm4, %v2808_v54 }
 0x21f   : > { %3116 = vmatpush3.bf16.msra.mxu1 %v2231_v55  ;;  %3117 = vmatprep.mubr.msk.bf16.mxu1 %vm3458_vm0, %v3457_v0 }
 0x220   : > { %3121 = vmatprep.subr.bf16.mxu1 %v3457_v0 }
 0x222   : > { %3004 = vmatmul.mubr.msk.bf16.vlgmr.msra.gmra.mrb[4].mxu0 %vm497_vm4, %v2772_v57 }
 0x223   : > { %3008 = vmatpush3.bf16.msra.mxu0 %v1313_v58  ;;  %3009 = vmatprep.mubr.msk.bf16.mxu0 %vm3458_vm0, %v3457_v0 }
 0x224   : > { %3013 = vmatprep.subr.bf16.mxu0 %v3457_v0  ;;  %v2553_v21 = vpop.permute.xlu0 %2552 }
 0x225   : > { %v2565_v30 = vrot.slane %v2553_v21, 6 }
 0x22a   : > { %3118 = vmatmul.mubr.msk.bf16.vlgmr.msra.gmra.mrb[0].mxu1 %vm497_vm4, %v2810_v60 }
 0x22b   : > { %3122 = vmatpush3.bf16.msra.mxu1 %v2282_v61  ;;  %3123 = vmatprep.mubr.msk.bf16.mxu1 %vm3458_vm0, %v3457_v0 }
 0x22c   : > { %3127 = vmatprep.subr.bf16.mxu1 %v3457_v0 }
 0x22e   : > { %3010 = vmatmul.mubr.msk.bf16.vlgmr.msra.gmra.mrb[4].mxu0 %vm497_vm4, %v2774_v63 }
 0x22f   : > { %3014 = vmatpush3.bf16.msra.mxu0 %v1364_v2  ;;  %3015 = vmatprep.mubr.msk.bf16.mxu0 %vm3458_vm0, %v3457_v0 }
 0x230   : > { %3145 = vmatprep.subr.bf16.mxu0 %v3457_v0 }
 0x236   : > { %3124 = vmatmul.mubr.msk.bf16.vlgmr.msra.gmra.mrb[0].mxu1 %vm497_vm4, %v2812_v4 }
 0x237   : > { %3128 = vmatpush3.bf16.msra.mxu1 %v2333_v5  ;;  %3129 = vmatprep.mubr.msk.bf16.mxu1 %vm3458_vm0, %v3457_v0 }
 0x238   : > { %3133 = vmatprep.subr.bf16.mxu1 %v3457_v0 }
 0x23a   : > { %3016 = vmatmul.mubr.msk.bf16.vlgmr.msra.gmra.mrb[4].mxu0 %vm497_vm4, %v2776_v6 }
 0x23b   : > { %3147 = vmatprep.mubr.msk.bf16.mxu0 %vm3458_vm0, %v3457_v0 }
 0x242   : > { %3130 = vmatmul.mubr.msk.bf16.vlgmr.msra.gmra.mrb[0].mxu1 %vm497_vm4, %v2814_v8 }
 0x243   : > { %3134 = vmatpush3.bf16.msra.mxu1 %v2384_v9  ;;  %3135 = vmatprep.mubr.msk.bf16.mxu1 %vm3458_vm0, %v3457_v0 }
 0x244   : > { %3139 = vmatprep.subr.bf16.mxu1 %v3457_v0 }
 0x24e   : > { %3136 = vmatmul.mubr.msk.bf16.vlgmr.msra.gmra.mrb[0].mxu1 %vm497_vm4, %v2816_v11 }
 0x24f   : > { %3140 = vmatpush3.bf16.msra.mxu1 %v2435_v12  ;;  %3141 = vmatprep.mubr.msk.bf16.mxu1 %vm3458_vm0, %v3457_v0 }
 0x25a   : > { %3142 = vmatmul.mubr.msk.bf16.vlgmr.msra.gmra.mrb[0].mxu1 %vm497_vm4, %v2818_v13 }
 0x276   : > { %v2501_v14 = vpop.permute.xlu1 %2500 }
 0x277   : > { %v2506_v15 = vsel %vm446_vm1, %v2501_v14, 0 }
 0x278   : > { %3146 = vmatpush3.bf16.msra.mxu0 %v2506_v15 }
 0x27b   : > { %3148 = vmatmul.mubr.msk.bf16.vlgmr.msra.gmra.mrb[8].mxu0 %vm442_vm2, %v2497_v16 }
 0x287   : > { %v2559_v25 = vpop.permute.xlu1 %2558 }
 0x288   : > { %v2568_v31 = vrot.slane %v2559_v25, 6 }
 0x30d   : > { %v1400_v17 = vpop.f32.mrb[4].mxu0 }
 0x30e   : > { %v3017_v18 = vpop.f32.mrb[5].mxu0 }
 0x30f   : > { %v1403_v19 = vpop.f32.mrb[6].mxu0 }
 0x310   : > { %v3018_v20 = vpop.f32.mrb[7].mxu0 }
 0x32d   : > { %v2471_v0 = vpop.f32.mrb[0].mxu1 }
 0x32e   : > { %v3151_v22 = vadd.f32 %v2471_v0, %v1400_v17  ;;  %v3143_v23 = vpop.f32.mrb[1].mxu1 }
 0x32f   : > { %v2474_v24 = vpop.f32.mrb[2].mxu1 }
 0x330   : > { %v2555_v26 = vmul.f32 %v3151_v22, %v2553_v21  ;;  %v3144_v27 = vpop.f32.mrb[3].mxu1 }
 0x332   : > { %v2561_v28 = vadd.f32 %v2559_v25, %v2555_v26 }
 0x334   : > { %v2562_v29 = vmax.f32 %v2561_v28, 0.0 }
 0x336   : > { %2564 = vst.msk [vmem:[%s433_s9] sm:$0x3f] %vm2563_vm7, %v2562_v29 }
 0x34e   : > { %v2542_v32 = vpop.f32.mrb[8].mxu0 }
 0x34f   : > { %v2567_v33 = vmul.f32 %v2565_v30, %v2542_v32  ;;  %v3149_v34 = vpop.f32.mrb[9].mxu0 }
 0x350   : > { %v2545_v35 = vpop.f32.mrb[10].mxu0 }
 0x351   : > { %v2570_v36 = vadd.f32 %v2568_v31, %v2567_v33  ;;  %v3150_v37 = vpop.f32.mrb[11].mxu0 }
 0x353   : > { %v2571_v38 = vmax.f32 %v2570_v36, 0.0 }
 0x355   : > { %2573 = vst.msk [vmem:[%s433_s9 + $0x6] sm:$0x3] %vm2572_vm8, %v2571_v38 }
 0x356 PF: > { %s16_s27 = sadd.s32 1, %s3455_s27   ;;  %s3962_s21 = smov %s3443_s24 }
 0x357   : > { %p13_p9 = scmp.ge.s32.totalorder %s16_s27, 26   ;;  %s3963_s22 = smov %s3447_s25 }
 0x358   : > { %s3964_s23 = smov %s3451_s26  ;;  %s3965_s24 = smov %s3969_s28 }
 0x359   : > { %s3966_s25 = smov %s3973_s29  ;;  %s3967_s26 = smov %s3977_s30 }
 0x35a   :  { %15 = sbr.rel (!%p13_p9) target bundleno = 4 (0x4), region = 127 }

</bundles_post_ra>
